<compile_context>
chip_gen: v7x
topology: tpu7x:2x2x1
jax: 0.10.0
libtpu: 0.0.40
codegen_flags: <defaults>
</compile_context>

<pallas_src>
import functools
import math

import numpy as np
import jax
import jax.numpy as jnp
from jax.experimental import pallas as pl
from jax.experimental.pallas import tpu as pltpu


# ----------------------------------------------------------------------------- kernels

def _matmul_kernel(x_ref, w_ref, b_ref, o_ref, *, activation):
    # x: (M, K) f32, w: (K, tn) bf16, b: (1, tn) f32
    x = x_ref[...].astype(jnp.bfloat16)
    y = jnp.dot(x, w_ref[...], preferred_element_type=jnp.float32)
    y = y + b_ref[...]
    if activation == "relu":
        y = jnp.maximum(y, 0.0)
    o_ref[...] = y


def _attn_kernel(q_ref, k_ref, v_ref, nm_ref, o_ref, w_ref, *, scale, nhead):
    # q: (B*H, L, hd), k/v: (B*H, S, hd), nm: additive mask (B*H, 1, S)
    q = q_ref[...]
    k = k_ref[...]
    v = v_ref[...]
    s = jnp.einsum("nld,nsd->nls", q, k, preferred_element_type=jnp.float32) * scale
    s = s + nm_ref[...]                                    # -1e30 at padded keys
    s_max = jnp.max(s, axis=-1, keepdims=True)
    p = jnp.exp(s - s_max)
    p = p / jnp.sum(p, axis=-1, keepdims=True)
    o_ref[...] = jnp.einsum("nls,nsd->nld", p, v, preferred_element_type=jnp.float32)
    n, L, S = p.shape
    w_ref[...] = jnp.mean(p.reshape(n // nhead, nhead, L, S), axis=1)   # head-avg weights


def _outproj_ln_kernel(a_ref, r_ref, w_ref, b_ref, g_ref, bt_ref, o_ref, *, eps):
    # fused: out-projection + bias + residual add + LayerNorm
    a = a_ref[...].astype(jnp.bfloat16)
    y = jnp.dot(a, w_ref[...], preferred_element_type=jnp.float32)
    y = y + b_ref[...] + r_ref[...]
    mu = jnp.mean(y, axis=-1, keepdims=True)
    var = jnp.mean(jnp.square(y - mu), axis=-1, keepdims=True)
    o_ref[...] = (y - mu) * jax.lax.rsqrt(var + eps) * g_ref[...] + bt_ref[...]


def _ffn_kernel(x_ref, w1_ref, b1_ref, w2_ref, b2_ref, g_ref, bt_ref, o_ref,
                acc_ref, *, eps, final_ln):
    # fused FFN: grid over the hidden dim; acc accumulates the w2 contraction.
    k = pl.program_id(0)

    @pl.when(k == 0)
    def _():
        acc_ref[...] = jnp.zeros_like(acc_ref)

    x = x_ref[...]                                        # (M, D) f32, resident block
    h = jnp.dot(x.astype(jnp.bfloat16), w1_ref[...],
                preferred_element_type=jnp.float32)
    h = jnp.maximum(h + b1_ref[...], 0.0)
    acc_ref[...] += jnp.dot(h.astype(jnp.bfloat16), w2_ref[...],
                            preferred_element_type=jnp.float32)

    @pl.when(k == pl.num_programs(0) - 1)
    def _():
        y = x + b2_ref[...] + acc_ref[...]                # residual + linear2 bias + FFN
        if final_ln:
            mu = jnp.mean(y, axis=-1, keepdims=True)
            var = jnp.mean(jnp.square(y - mu), axis=-1, keepdims=True)
            y = (y - mu) * jax.lax.rsqrt(var + eps) * g_ref[...] + bt_ref[...]
        o_ref[...] = y


def _pool_kernel(y_ref, m_ref, o_ref, *, pool_type):
    y = y_ref[...]                                        # (B, L, D)
    valid = (m_ref[...] == 0.0).astype(jnp.float32)       # (B, L)
    if pool_type == "avg":
        s = jnp.sum(y * valid[:, :, None], axis=1)
        cnt = jnp.sum(valid, axis=1, keepdims=True)
        o_ref[...] = s / cnt
    else:  # max
        o_ref[...] = jnp.max(jnp.where(valid[:, :, None] > 0.0, y, -1e30), axis=1)


# ----------------------------------------------------------------------------- wrappers

def matmul(x, w, b, activation=None, tn=512):
    """x: (M, K) f32, w: (K, Np) bf16 with Np a multiple of tn (tn multiple of 128)."""
    M, K = x.shape
    Np = w.shape[1]
    assert Np % tn == 0 and tn % 128 == 0
    return pl.pallas_call(
        functools.partial(_matmul_kernel, activation=activation),
        grid=(Np // tn,),
        out_shape=jax.ShapeDtypeStruct((M, Np), jnp.float32),
        in_specs=[pl.BlockSpec((M, K), lambda j: (0, 0)),
                  pl.BlockSpec((K, tn), lambda j: (0, j)),
                  pl.BlockSpec((1, tn), lambda j: (0, j))],
        out_specs=pl.BlockSpec((M, tn), lambda j: (0, j)),
        compiler_params=pltpu.CompilerParams(dimension_semantics=("parallel",)),
    )(x, w, b)


def attention(qh, kh, vh, neg_mask_bh, scale, nhead):
    """qh: (B*H, L, hd), kh/vh: (B*H, S, hd), neg_mask_bh: (B*H, 1, S) additive."""
    BH, L, hd = qh.shape
    S = kh.shape[1]
    B = BH // nhead
    return pl.pallas_call(
        functools.partial(_attn_kernel, scale=scale, nhead=nhead),
        grid=(1,),
        out_shape=(jax.ShapeDtypeStruct((BH, L, hd), jnp.float32),
                   jax.ShapeDtypeStruct((B, L, S), jnp.float32)),
        in_specs=[pl.BlockSpec((BH, L, hd), lambda i: (0, 0, 0)),
                  pl.BlockSpec((BH, S, hd), lambda i: (0, 0, 0)),
                  pl.BlockSpec((BH, S, hd), lambda i: (0, 0, 0)),
                  pl.BlockSpec((BH, 1, S), lambda i: (0, 0, 0))],
        out_specs=(pl.BlockSpec((BH, L, hd), lambda i: (0, 0, 0)),
                   pl.BlockSpec((B, L, S), lambda i: (0, 0, 0))),
    )(qh, kh, vh, neg_mask_bh)


def outproj_add_ln(a, res, w, b, g, bt, eps=1e-5):
    """LayerNorm((a @ w + b) + res)."""
    M, D = a.shape
    return pl.pallas_call(
        functools.partial(_outproj_ln_kernel, eps=eps),
        grid=(1,),
        out_shape=jax.ShapeDtypeStruct((M, D), jnp.float32),
        in_specs=[pl.BlockSpec((M, D), lambda i: (0, 0)),
                  pl.BlockSpec((M, D), lambda i: (0, 0)),
                  pl.BlockSpec((D, D), lambda i: (0, 0)),
                  pl.BlockSpec((1, D), lambda i: (0, 0)),
                  pl.BlockSpec((1, D), lambda i: (0, 0)),
                  pl.BlockSpec((1, D), lambda i: (0, 0))],
        out_specs=pl.BlockSpec((M, D), lambda i: (0, 0)),
    )(a, res, w, b, g, bt)


def ffn_block(x, w1, b1, w2, b2, g, bt, final_ln, th=512, eps=1e-5):
    """out = [LayerNorm]( x + (relu(x@w1+b1) @ w2 + b2) ), gridded over hidden dim."""
    M, D = x.shape
    Hff = w1.shape[1]
    assert Hff % th == 0 and th % 128 == 0
    return pl.pallas_call(
        functools.partial(_ffn_kernel, eps=eps, final_ln=final_ln),
        grid=(Hff // th,),
        out_shape=jax.ShapeDtypeStruct((M, D), jnp.float32),
        in_specs=[pl.BlockSpec((M, D), lambda k: (0, 0)),
                  pl.BlockSpec((D, th), lambda k: (0, k)),
                  pl.BlockSpec((1, th), lambda k: (0, k)),
                  pl.BlockSpec((th, D), lambda k: (k, 0)),
                  pl.BlockSpec((1, D), lambda k: (0, 0)),
                  pl.BlockSpec((1, D), lambda k: (0, 0)),
                  pl.BlockSpec((1, D), lambda k: (0, 0))],
        out_specs=pl.BlockSpec((M, D), lambda k: (0, 0)),
        scratch_shapes=[pltpu.VMEM((M, D), jnp.float32)],
        compiler_params=pltpu.CompilerParams(dimension_semantics=("arbitrary",)),
    )(x, w1, b1, w2, b2, g, bt)


def masked_pool(y, mask_f, pool_type):
    B, L, D = y.shape
    return pl.pallas_call(
        functools.partial(_pool_kernel, pool_type=pool_type),
        grid=(1,),
        out_shape=jax.ShapeDtypeStruct((B, D), jnp.float32),
        in_specs=[pl.BlockSpec((B, L, D), lambda i: (0, 0, 0)),
                  pl.BlockSpec((B, L), lambda i: (0, 0))],
        out_specs=pl.BlockSpec((B, D), lambda i: (0, 0)),
    )(y, mask_f)


# ----------------------------------------------------------------------------- model glue

def mha_forward(query, memory, neg_mask_bh, p, nhead, d_pad):
    """nn.MultiheadAttention (batch_first=False, eval).  key == value == memory."""
    L, B, D = query.shape
    S = memory.shape[0]
    hd = D // nhead
    Mq = L * B
    xq = query.reshape(Mq, D)
    xm = memory.reshape(S * B, D)
    # one packed, padded QKV projection over stacked [query rows ; memory rows]
    xs = jnp.concatenate([xq, xm], axis=0)
    qkv = matmul(xs, p["w_qkv"], p["b_qkv"])                       # (2M, 3*d_pad)
    q2 = qkv[:Mq, 0:D]
    k2 = qkv[Mq:, d_pad:d_pad + D]
    v2 = qkv[Mq:, 2 * d_pad:2 * d_pad + D]
    qh = q2.reshape(L, B, nhead, hd).transpose(1, 2, 0, 3).reshape(B * nhead, L, hd)
    kh = k2.reshape(S, B, nhead, hd).transpose(1, 2, 0, 3).reshape(B * nhead, S, hd)
    vh = v2.reshape(S, B, nhead, hd).transpose(1, 2, 0, 3).reshape(B * nhead, S, hd)
    ctx, w = attention(qh, kh, vh, neg_mask_bh, 1.0 / math.sqrt(hd), nhead)
    attn_concat = ctx.reshape(B, nhead, L, hd).transpose(2, 0, 1, 3).reshape(Mq, D)
    return attn_concat, w                                          # w: (B, L, S)


def encoder_layer_forward(src, neg_mask_bh, p, nhead, d_pad):
    L, B, D = src.shape
    attn_concat, w = mha_forward(src, src, neg_mask_bh, p["attn"], nhead, d_pad)
    # norm1( src + attn_out @ Wo + bo )   (dropout1 = identity in eval)
    x = outproj_add_ln(attn_concat, src.reshape(L * B, D),
                       p["attn"]["wo"], p["attn"]["bo"], p["norm1_g"], p["norm1_b"])
    # norm2( x + FFN(x) )                 (dropout / dropout2 = identity)
    y = ffn_block(x, p["w1"], p["b1"], p["w2"], p["b2"],
                  p["norm2_g"], p["norm2_b"], final_ln=True)
    return y.reshape(L, B, D), w


def decoder_layer_forward(q, memory, neg_mask_bh, p, nhead, d_pad, dummy_g, dummy_b):
    L, B, D = q.shape
    attn_concat, w = mha_forward(q, memory, neg_mask_bh, p["attn"], nhead, d_pad)
    # norm3( q + attn_out @ Wo + bo )     (dropout2 = identity)
    x = outproj_add_ln(attn_concat, q.reshape(L * B, D),
                       p["attn"]["wo"], p["attn"]["bo"], p["norm3_g"], p["norm3_b"])
    # x + FFN(x)                          (dropout3 = identity, no final norm)
    y = ffn_block(x, p["w1"], p["b1"], p["w2"], p["b2"],
                  dummy_g, dummy_b, final_ln=False)
    return y.reshape(L, B, D), w


def transformer_forward(features, im_idx, pool_type, params, nhead, d_pad):
    """cross_attention=True path of transformer.forward (split=False)."""
    decoder_query, encoder_query = features              # (N, 512), (N, 1424)
    D = encoder_query.shape[1]

    # host-side ragged packing (trace-time; matches the python loops in the module)
    im_np = np.asarray(im_idx)
    b = int(im_np[-1]) + 1
    counts = np.bincount(im_np, minlength=b)
    l = int(counts.max())
    rank = np.zeros_like(im_np)
    seen = {}
    for j, f in enumerate(im_np.tolist()):
        rank[j] = seen.get(f, 0)
        seen[f] = int(rank[j]) + 1

    rel_input = jnp.zeros((l, b, D), jnp.float32).at[rank, im_np].set(encoder_query)
    masks_f = jnp.asarray((np.arange(l)[None, :] >= counts[:, None]).astype(np.float32))
    neg = jnp.where(masks_f > 0.0, -1e30, 0.0)            # (b, l) additive key mask
    neg_bh = jnp.broadcast_to(neg[:, None, None, :], (b, nhead, 1, l)
                              ).reshape(b * nhead, 1, l)

    # local (spatial) encoder
    local_out = rel_input
    local_ws = []
    for p_layer in params["enc_layers"]:
        local_out, w = encoder_layer_forward(local_out, neg_bh, p_layer, nhead, d_pad)
        local_ws.append(w)
    local_w = jnp.stack(local_ws, axis=0)                 # (enc_layers, b, l, l)

    # project decoder query 512 -> 1424 (padded weight, slice back) and pack
    proj = matmul(decoder_query, params["proj_w"], params["proj_b"])[:, :D]
    decoder_input = jnp.zeros((l, b, D), jnp.float32).at[rank, im_np].set(proj)

    # global (temporal) decoder
    dummy_g = jnp.ones((1, D), jnp.float32)
    dummy_b = jnp.zeros((1, D), jnp.float32)
    out = decoder_input
    global_ws = []
    for p_layer in params["dec_layers"]:
        out, w = decoder_layer_forward(out, local_out, neg_bh, p_layer, nhead, d_pad,
                                       dummy_g, dummy_b)
        global_ws.append(w)
    global_w = jnp.stack(global_ws, axis=0)               # (dec_layers, b, l, l)

    # masked per-frame pooling of the (b, l, d) decoder output
    y_bld = jnp.transpose(out, (1, 0, 2))
    output = masked_pool(y_bld, masks_f, pool_type)       # (b, d)
    return output, global_w, local_w


# ----------------------------------------------------------------------------- params

def _init_linear(key, fan_in, fan_out, scale=0.02):
    kw, kb = jax.random.split(key)
    w = scale * jax.random.normal(kw, (fan_in, fan_out), jnp.float32)
    b = scale * jax.random.normal(kb, (fan_out,), jnp.float32)
    return w, b


def _pad_cols(w, n):
    return jnp.pad(w, ((0, 0), (0, n - w.shape[1])))


def _pad_vec(v, n):
    return jnp.pad(v, (0, n - v.shape[0]))


def _init_attn(key, d, d_pad):
    ks = jax.random.split(key, 4)
    wq, bq = _init_linear(ks[0], d, d)
    wk, bk = _init_linear(ks[1], d, d)
    wv, bv = _init_linear(ks[2], d, d)
    wo, bo = _init_linear(ks[3], d, d)
    w_qkv = jnp.concatenate(
        [_pad_cols(wq, d_pad), _pad_cols(wk, d_pad), _pad_cols(wv, d_pad)],
        axis=1).astype(jnp.bfloat16)                                   # (d, 3*d_pad)
    b_qkv = jnp.concatenate(
        [_pad_vec(bq, d_pad), _pad_vec(bk, d_pad), _pad_vec(bv, d_pad)]
    ).reshape(1, 3 * d_pad)
    return dict(w_qkv=w_qkv, b_qkv=b_qkv,
                wo=wo.astype(jnp.bfloat16), bo=bo.reshape(1, d))


def _init_enc_layer(key, d, d_pad, dff):
    ks = jax.random.split(key, 3)
    p = dict(attn=_init_attn(ks[0], d, d_pad))
    w1, b1 = _init_linear(ks[1], d, dff)
    w2, b2 = _init_linear(ks[2], dff, d)
    p["w1"] = w1.astype(jnp.bfloat16); p["b1"] = b1.reshape(1, dff)
    p["w2"] = w2.astype(jnp.bfloat16); p["b2"] = b2.reshape(1, d)
    p["norm1_g"] = jnp.ones((1, d), jnp.float32); p["norm1_b"] = jnp.zeros((1, d), jnp.float32)
    p["norm2_g"] = jnp.ones((1, d), jnp.float32); p["norm2_b"] = jnp.zeros((1, d), jnp.float32)
    return p


def _init_dec_layer(key, d, d_pad, dff):
    ks = jax.random.split(key, 3)
    p = dict(attn=_init_attn(ks[0], d, d_pad))
    w1, b1 = _init_linear(ks[1], d, dff)
    w2, b2 = _init_linear(ks[2], dff, d)
    p["w1"] = w1.astype(jnp.bfloat16); p["b1"] = b1.reshape(1, dff)
    p["w2"] = w2.astype(jnp.bfloat16); p["b2"] = b2.reshape(1, d)
    p["norm3_g"] = jnp.ones((1, d), jnp.float32); p["norm3_b"] = jnp.zeros((1, d), jnp.float32)
    return p


def init_params(key, d, d_pad, dff, enc_layers, dec_layers, dec_in):
    ks = jax.random.split(key, enc_layers + dec_layers + 1)
    params = dict(
        enc_layers=[_init_enc_layer(ks[i], d, d_pad, dff) for i in range(enc_layers)],
        dec_layers=[_init_dec_layer(ks[enc_layers + i], d, d_pad, dff)
                    for i in range(dec_layers)],
    )
    pw, pb = _init_linear(ks[-1], dec_in, d)
    params["proj_w"] = _pad_cols(pw, d_pad).astype(jnp.bfloat16)       # (512, d_pad)
    params["proj_b"] = _pad_vec(pb, d_pad).reshape(1, d_pad)
    return params


# ----------------------------------------------------------------------------- main

if __name__ == "__main__":
    EMBED = 1424       # cross_attention=True => embed_dim hard-coded to 1424
    D_PAD = 1536       # 128-aligned padded width used for packed/padded weights
    DEC_IN = 512       # decoder_query feature dim (linear_projection: 512 -> 1424)
    NHEAD = 8
    DFF = 2048
    ENC_LAYERS = 1
    DEC_LAYERS = 3

    # frames: 3 frames with 3, 2, 3 boxes -> N=8, l=3, b=3
    im_idx = np.array([0, 0, 0, 1, 1, 2, 2, 2], dtype=np.int32)
    N = im_idx.shape[0]

    root = jax.random.PRNGKey(0)
    k_feat_dec, k_feat_enc, k_params = jax.random.split(root, 3)
    features_decoder = jax.random.normal(k_feat_dec, (N, DEC_IN), jnp.float32)
    features_encoder = jax.random.normal(k_feat_enc, (N, EMBED), jnp.float32)

    params = init_params(k_params, EMBED, D_PAD, DFF, ENC_LAYERS, DEC_LAYERS, DEC_IN)

    output, global_w, local_w = transformer_forward(
        (features_decoder, features_encoder), im_idx, "avg", params, NHEAD, D_PAD)

    jax.block_until_ready((output, global_w, local_w))
    assert output.shape == (3, EMBED)
    assert global_w.shape == (DEC_LAYERS, 3, 3, 3)
    assert local_w.shape == (ENC_LAYERS, 3, 3, 3)
    print("KERNEL_OK")
</pallas_src>

<mosaic_0001>
module attributes {stable_mosaic.version = 11 : i64} {
  func.func @_matmul_kernel(%arg0: i32, %arg1: memref<18x1424xf32, #tpu.memory_space<vmem>>, %arg2: memref<1424x512xbf16, #tpu.memory_space<vmem>>, %arg3: memref<1x512xf32, #tpu.memory_space<vmem>>, %arg4: memref<18x512xf32, #tpu.memory_space<vmem>>) attributes {dimension_semantics = [#tpu.dimension_semantics<parallel>], iteration_bounds = array<i64: 9>, scalar_prefetch = 0 : i64, scratch_operands = 0 : i64, tpu.core_type = #tpu.core_type<tc>, window_params = [{pipeline_mode = #tpu.pipeline_mode<synchronous>, transform_indices = @transform_0, window_bounds = array<i64: 18, 1424>}, {transform_indices = @transform_1, window_bounds = array<i64: 1424, 512>}, {transform_indices = @transform_2, window_bounds = array<i64: 1, 512>}, {transform_indices = @transform_3, window_bounds = array<i64: 18, 512>}]} {
    %c0 = arith.constant 0 : index
    %c0_0 = arith.constant 0 : index
    %0 = vector.load %arg1[%c0, %c0_0] : memref<18x1424xf32, #tpu.memory_space<vmem>>, vector<18x1424xf32>
    %1 = arith.truncf %0 : vector<18x1424xf32> to vector<18x1424xbf16>
    %c0_1 = arith.constant 0 : index
    %c0_2 = arith.constant 0 : index
    %2 = vector.load %arg2[%c0_1, %c0_2] : memref<1424x512xbf16, #tpu.memory_space<vmem>>, vector<1424x512xbf16>
    %cst = arith.constant dense<0.000000e+00> : vector<18x512xf32>
    %3 = tpu.matmul %1, %2, %cst {dimension_numbers = #tpu.dot_dimension_numbers<[1], [0], [0], [1], [0, 0, 1, 1], [], []>} : vector<18x1424xbf16>, vector<1424x512xbf16>, vector<18x512xf32> -> vector<18x512xf32>
    %c0_3 = arith.constant 0 : index
    %c0_4 = arith.constant 0 : index
    %4 = vector.load %arg3[%c0_3, %c0_4] : memref<1x512xf32, #tpu.memory_space<vmem>>, vector<1x512xf32>
    %5 = vector.broadcast %4 : vector<1x512xf32> to vector<18x512xf32>
    %6 = arith.addf %3, %5 : vector<18x512xf32>
    %c0_5 = arith.constant 0 : index
    %c0_6 = arith.constant 0 : index
    %7 = vector.load %arg4[%c0_5, %c0_6] : memref<18x512xf32, #tpu.memory_space<vmem>>, vector<18x512xf32>
    tpu.vector_store %arg4[%c0_5, %c0_6], %6 {strides = array<i32>} : memref<18x512xf32, #tpu.memory_space<vmem>>, vector<18x512xf32>,
    return
  }
  func.func @transform_0(%arg0: i32) -> (i32, i32) {
    %c0_i32 = arith.constant 0 : i32
    %c0_i32_0 = arith.constant 0 : i32
    %c0_i32_1 = arith.constant 0 : i32
    return %c0_i32, %c0_i32_0 : i32, i32
  }
  func.func @transform_1(%arg0: i32) -> (i32, i32) {
    %c0_i32 = arith.constant 0 : i32
    %c0_i32_0 = arith.constant 0 : i32
    return %c0_i32, %arg0 : i32, i32
  }
  func.func @transform_2(%arg0: i32) -> (i32, i32) {
    %c0_i32 = arith.constant 0 : i32
    %c0_i32_0 = arith.constant 0 : i32
    return %c0_i32, %arg0 : i32, i32
  }
  func.func @transform_3(%arg0: i32) -> (i32, i32) {
    %c0_i32 = arith.constant 0 : i32
    %c0_i32_0 = arith.constant 0 : i32
    return %c0_i32, %arg0 : i32, i32
  }
}

</mosaic_0001>

<bundles_post_ra>
// kernel: tpu_custom_call.1
= control target key start
LH: loop header
LB: loop body
LE: loop exit
PB: predicated region body
PF: predicated region fallthrough
CT: control target
= control target key end

     0   :  { %8 = vsyncpa [#allocation3], 0  ;;  %s5100_s0 = inlined_call_operand.hbm [shape: f32[18,1424], index: 0, kind: input, shape index: {}]   ;;  %s5101_s1 = inlined_call_operand.hbm [shape: bf16[1424,4608], index: 1, kind: input, shape index: {}]   ;;  %s5102_s2 = inlined_call_operand.hbm [shape: f32[1,4608], index: 2, kind: input, shape index: {}]   ;;  %s5103_s3 = inlined_call_operand.hbm [shape: f32[18,4608], index: 3, kind: output, shape index: {}]  }
   0x1   :  { %9 = vsyncpa [#allocation6], 0 }
   0x2   :  { %11 = vsyncpa [#allocation6 + $0x1], 0 }
   0x3   :  { %12 = vsyncpa [#allocation4], 0 }
   0x4   :  { %14 = vsyncpa [#allocation4 + $0x1], 0  ;;  %s4481_s12 = smov 0   ;;  %s4483_s13 = smov 0  }
   0x5   :  { %s4485_s14 = smov 0   ;;  %s4487_s15 = smov 0  }
   0x6 LB: > { %s4502_s16 = sadd.s32 1, %s4447_s15   ;;  %s48_s17 = sadd.s32 1, %s4443_s14  ;;  %s4447_s15 = sphi %s4487_s15, %s5129_s15   ;;  %s4443_s14 = sphi %s4485_s14, %s5128_s14   ;;  %s4439_s13 = sphi %s4483_s13, %s5127_s13   ;;  %s4435_s12 = sphi %s4481_s12, %s5126_s12  }
   0x7   : > { %s45_s18 = ssub.s32 %s4447_s15, %s4502_s16  ;;  %p55_p0 = scmp.ne.s32.totalorder %s4443_s14, %s4439_s13 }
   0x8   : > { %p46_p1 = scmp.eq.s32.totalorder %s45_s18, 0  ;;  %p56_p2 = scmp.eq.s32.totalorder %s4447_s15, 0 }
   0x9   : > { %p3711_p3 = scmp.lt.s32.totalorder %s4447_s15, 9  ;;  %s150_s20 = sand.u32 1, %s4447_s15  }
   0xa   : > { %s4512_s19 = scalar_select %p46_p1, %s4443_s14, %s48_s17  }
   0xb   : > { %p57_p4 = por %p56_p2, %p55_p0  ;;  %s152_s21 = sand.u32 1, %s4443_s14  }
   0xc   : > { %s3682_s22 = smul.u32 2848, %s152_s21  ;;  %s3587_s23 = sshll.u32 %s4447_s15, 8 }
   0xd   : > { %s4525_s26 = scalar_lea.hbm %s5101_s1, %s3587_s23  ;;  %p4527_p5 = pnand %p3711_p3, %p57_p4 }
   0xe   : > { %s154_s28 = scalar_lea.vmem [#allocation5], %s3682_s22  ;;  %s4533_s30 = scalar_lea.sflag [#allocation6], %s150_s20 }
   0xf   : > { %s5111_s27 = scalar_select %p4527_p5, 1, 0 }
  0x10   : > { %s161_s29 = sshll.u32 %s154_s28, 4  ;;  %s4289_s4 = scalar_lea.hbm %s4525_s26, 45568  ;;  %s4531_s29 = int_to_ptr.vmem [resolvable:$true] %s161_s29 }
  0x11   : > { %p4290_p6 = scmp.ne.s32.totalorder %s4525_s26, %s4289_s4  ;;  %p5105_p7 = pneg %p4527_p5 }
  0x12   : > { %s4294_s7 = scalar_lea.hbm %s5101_s1, 410112  ;;  %p4295_p10 = scmp.lt.u32.totalorder %s4525_s26, %s5101_s1 }
  0x13   : > { %p4292_p8 = pnand %p5105_p7, %p4290_p6  ;;  %p4296_p11 = scmp.lt.u32.totalorder %s4294_s7, %s4289_s4 }
  0x14   : > { %p4298_p13 = scmp.lt.u32.totalorder %s4289_s4, %s4525_s26 }
  0x15   : > { %p4293_p9 = pneg %p4292_p8  ;;  %p4297_p12 = por %p4296_p11, %p4295_p10 }
  0x17   : > { %p4299_p1 = por %p4298_p13, %p4297_p12 }
  0x19   : > { %p4300_p2 = pnand %p4299_p1, %p4293_p9 }
  0x1b   : > { %4303 = shalt.err (!%p4300_p2)
}
  0x1c   : > { %s4304_s10 = scalar_lea.vmem %s4531_s29, 45568  ;;  %s4449_s11 = smov [#allocation5]  }
  0x1d   : > { %p4305_p3 = scmp.ne.s32.totalorder %s4531_s29, %s4304_s10  ;;  %s4309_s17 = sshll.u32 %s4449_s11, 4  ;;  %s4310_s17 = int_to_ptr.vmem [resolvable:$false] %s4309_s17 }
  0x1e   : > { %s4311_s18 = scalar_lea.vmem %s4310_s17, 91136  ;;  %p4312_p8 = scmp.lt.s32.totalorder %s4531_s29, %s4310_s17 }
  0x1f   : > { %p4307_p4 = pnand %p4305_p3, %p5105_p7  ;;  %p4313_p10 = scmp.lt.s32.totalorder %s4311_s18, %s4304_s10 }
  0x21   : > { %p4308_p6 = pneg %p4307_p4  ;;  %p4314_p11 = por %p4313_p10, %p4312_p8 }
  0x23   : > { %p4315_p12 = pnand %p4314_p11, %p4308_p6 }
  0x25   : > { %4318 = shalt.err (!%p4315_p12)
}
  0x26   : > { %s4450_s20 = smov 2304   ;;  %s4451_s22 = smov 256  }
  0x27   : > { %s4452_s23 = smov 16   ;;  %s4562_s24 = sadd.s32 4294967295, %s4447_s15  }
  0x28   : > { %3702 = dma.hbm_to_vmem [thread:$0]  (!%p4527_p5), %s4525_s26, 45568, %s4531_s29, %s4533_s30, %s4450_s20, %s4451_s22, %s4452_s23  }
  0x29   : > { %s3211_s25 = sadd.s32 4294967294, %s4447_s15   ;;  %p61_p9 = scmp.ne.s32.totalorder %s4439_s13, %s4435_s12 }
  0x2a   : > { %p5104_p13 = scmp.eq.s32.totalorder %s4562_s24, 0  ;;  %p111_p1 = scmp.eq.s32.totalorder %s4562_s24, 8 }
  0x2b   : > { %p117_p2 = scmp.eq.s32.totalorder %s3211_s25, 8  ;;  %p3212_p3 = scmp.ge.s32.totalorder %s4447_s15, 1 }
  0x2c   : > { %p4572_p4 = por %p5104_p13, %p61_p9  ;;  %p4579_p6 = por %p111_p1, %p55_p0 }
  0x2d   : > { %p4583_p8 = por %p117_p2, %p61_p9  ;;  %p124_p10 = scmp.lt.s32.totalorder %s4447_s15, 10 }
  0x2e   : > { %s5112_s28 = scalar_select %p4572_p4, 1, 0 }
  0x2f   : > { %s5113_s26 = scalar_select %p4579_p6, 1, 0 }
  0x30   : > { %s5114_s29 = scalar_select %p4583_p8, 1, 0 }
  0x31   : > { %p4588_p11 = pnand %p3212_p3, %p124_p10  ;;  %s4453_s5 = smov [#allocation2]  }
  0x32   : > { %s136_s6 = sshll.u32 %s4453_s5, 4  ;;  %s3217_s7 = sshll.u32 %s152_s21, 2  ;;  %s4592_s6 = int_to_ptr.vmem [resolvable:$true] %s136_s6 }
  0x33   : > { %s5115_s4 = scalar_select %p4588_p11, 1, 0 }
  0x34   : > { %p3695_p12 = pneg %p4588_p11  ;;  %s3588_s8 = sshll.u32 %s4447_s15, 6 }
  0x35   : > { %s4608_s17 = scalar_lea.hbm %s5102_s2, %s3588_s8  ;;  %s175_s18 = scalar_lea.vmem [#allocation7], %s3217_s7 }
  0x36   : > { %p4601_p0 = pnand %p3695_p12, %p5104_p13  ;;  %s183_s20 = sshll.u32 %s175_s18, 4  ;;  %s4610_s20 = int_to_ptr.vmem [resolvable:$true] %s183_s20 }
  0x37   : > { %s4319_s21 = scalar_lea.hbm %s5100_s0, 4608 }
  0x38   : > { %p4320_p9 = scmp.ne.s32.totalorder %s5100_s0, %s4319_s21  ;;  %p4321_p1 = pneg %p4601_p0 }
  0x39   : > { %p4326_p10 = scmp.lt.u32.totalorder %s4319_s21, %s5100_s0 }
  0x3a   : > { %p4322_p2 = pnand %p4321_p1, %p4320_p9 }
  0x3c   : > { %p4323_p3 = pneg %p4322_p2 }
  0x3e   : > { %p4328_p12 = pnand %p4326_p10, %p4323_p3 }
  0x40   : > { %4331 = shalt.err (!%p4328_p12)
}
  0x41   : > { %s4332_s7 = scalar_lea.vmem %s4592_s6, 4608  ;;  %p4340_p6 = scmp.lt.s32.totalorder %s4592_s6, %s4592_s6 }
  0x42   : > { %p4333_p13 = scmp.ne.s32.totalorder %s4592_s6, %s4332_s7  ;;  %p4341_p4 = scmp.lt.s32.totalorder %s4332_s7, %s4332_s7 }
  0x44   : > { %p4335_p7 = pnand %p4333_p13, %p4321_p1  ;;  %p4342_p11 = por %p4341_p4, %p4340_p6 }
  0x46   : > { %p4336_p8 = pneg %p4335_p7 }
  0x48   : > { %p4343_p5 = pnand %p4342_p11, %p4336_p8 }
  0x4a   : > { %4346 = shalt.err (!%p4343_p5)
}
  0x4b   : > { %s4454_s8 = smov 1536   ;;  %s4455_s18 = smov 96  }
  0x4c   : > { %3698 = dma.hbm_to_vmem [thread:$0]  (!%p4601_p0), %s5100_s0, 4608, %s4592_s6, [#allocation3], %s4454_s8, %s4454_s8, %s4455_s18  }
  0x4d   : > { %s4347_s21 = scalar_lea.hbm %s4608_s17, 64  ;;  %p5117_p13 = scmp.ne.s32.totalorder %s5111_s27, 0 }
  0x4e   : > { %p4348_p7 = scmp.ne.s32.totalorder %s4608_s17, %s4347_s21  ;;  %s4352_s10 = scalar_lea.hbm %s5102_s2, 576 }
  0x4f   : > { %p5118_p4 = pneg %p5117_p13  ;;  %p4353_p8 = scmp.lt.u32.totalorder %s4608_s17, %s5102_s2 }
  0x50   : > { %p4354_p11 = scmp.lt.u32.totalorder %s4352_s10, %s4347_s21  ;;  %p4356_p1 = scmp.lt.u32.totalorder %s4347_s21, %s4608_s17 }
  0x51   : > { %p4350_p6 = pnand %p4348_p7, %p5118_p4 }
  0x52   : > { %p4355_p9 = por %p4354_p11, %p4353_p8 }
  0x53   : > { %p4351_p5 = pneg %p4350_p6 }
  0x54   : > { %p4357_p2 = por %p4356_p1, %p4355_p9 }
  0x56   : > { %p4358_p3 = pnand %p4357_p2, %p4351_p5 }
  0x58   : > { %4361 = shalt.err (!%p4358_p3)
}
  0x59   : > { %s4362_s6 = scalar_lea.vmem %s4610_s20, 64  ;;  %p5119_p10 = pmov %p5118_p4 }
  0x5a   : > { %p4363_p0 = scmp.ne.s32.totalorder %s4610_s20, %s4362_s6  ;;  %s4456_s9 = smov [#allocation7]  }
  0x5b   : > { %s4367_s8 = sshll.u32 %s4456_s9, 4  ;;  %s4368_s8 = int_to_ptr.vmem [resolvable:$false] %s4367_s8 }
  0x5c   : > { %p4365_p12 = pnand %p4363_p0, %p5119_p10  ;;  %s4369_s18 = scalar_lea.vmem %s4368_s8, 128 }
  0x5d   : > { %p4370_p4 = scmp.lt.s32.totalorder %s4610_s20, %s4368_s8  ;;  %p4371_p6 = scmp.lt.s32.totalorder %s4369_s18, %s4362_s6 }
  0x5e   : > { %p4366_p7 = pneg %p4365_p12 }
  0x5f   : > { %p4372_p8 = por %p4371_p6, %p4370_p4 }
  0x61   : > { %p4373_p11 = pnand %p4372_p8, %p4366_p7 }
  0x63   : > { %4376 = shalt.err (!%p4373_p11)
}
  0x64   : > { %3705 = dma.hbm_to_vmem [thread:$0]  (!%p5117_p13), %s4608_s17, 64, %s4610_s20, %s4533_s30  }
  0x65   : > { %p5120_p5 = scmp.ne.s32.totalorder %s5115_s4, 0 }
  0x66   : > { %p5121_p9 = scmp.eq.s32.totalorder (!%p5120_p5), %s4562_s24, 0 }
  0x67   : > { %192 = sbr.rel (%p5120_p5) target bundleno = 712 (0x2c8), region = 32 }
  0x6e   : > { %4422 = dma.done.wait (%p5121_p9), [#allocation3], 4608   ;;  %p5122_p1 = pmov %p5121_p9 }
  0x6f   : > { %s198_s22 = sand.u32 1, %s4562_s24   ;;  %s4665_s23 = sand.u32 1, %s4439_s13  }
  0x70   : > { %4424 = vsyncadd (%p5122_p1), [#allocation3], 4294962688  ;;  %s3683_s27 = smul.u32 2848, %s4665_s23  ;;  %s199_s21 = scalar_lea.sflag [#allocation6], %s198_s22 }
  0x71   : > { %p5123_p13 = scmp.ne.s32.totalorder %s5112_s28, 0 }
  0x72   : > { %s4668_s25 = scalar_lea.vmem [#allocation5], %s3683_s27 }
  0x73   : > { %4426 = dma.done.wait (%p5123_p13), %s199_s21, 45632  }
  0x74   : > { %4428 = vsyncadd (%p5123_p13), %s199_s21, 4294921664  ;;  %v3755_v0 = vld [vmem:[%s4668_s25 + $0x4] ss:$16 sps:$4 sm:$0xff]   ;;  %v3757_v1 = vld [vmem:[%s4668_s25 + $0xc] ss:$16 sps:$4 sm:$0xff]   ;;  %vm2461_vm0 = vcmask 130048  }
  0x75   : > { %2468 = vmatprep.subr.bf16.mxu0 %v3755_v0  ;;  %v3759_v2 = vld [vmem:[%s4668_s25] ss:$16 sps:$4 sm:$0xff]   ;;  %v3760_v3 = vld [vmem:[%s4668_s25 + $0x8] ss:$16 sps:$4 sm:$0xff]   ;;  %2774 = vmatprep.subr.bf16.mxu1 %v3757_v1  ;;  %v3761_v4 = vld [vmem:[%s4668_s25 + $0x24] ss:$16 sps:$4 sm:$0xff]  }
  0x76   : > { %2469 = vmatpush1.bf16.msra.mxu0 %v3759_v2  ;;  %2775 = vmatpush1.bf16.msra.mxu1 %v3760_v3  ;;  %v3763_v5 = vld [vmem:[%s4668_s25 + $0x2c] ss:$16 sps:$4 sm:$0xff]   ;;  %v3765_v6 = vld [vmem:[%s4668_s25 + $0x20] ss:$16 sps:$4 sm:$0xff]   ;;  %v3766_v7 = vld [vmem:[%s4668_s25 + $0x28] ss:$16 sps:$4 sm:$0xff]  }
  0x77   : > { %2470 = vmatprep.subr.bf16.mxu0 %v3761_v4  ;;  %2776 = vmatprep.subr.bf16.mxu1 %v3763_v5  ;;  %v3767_v8 = vld [vmem:[%s4668_s25 + $0x44] ss:$16 sps:$4 sm:$0xff]   ;;  %v3769_v9 = vld [vmem:[%s4668_s25 + $0x4c] ss:$16 sps:$4 sm:$0xff]   ;;  %v3771_v10 = vld [vmem:[%s4668_s25 + $0x40] ss:$16 sps:$4 sm:$0xff]  }
  0x78   : > { %v3772_v11 = vld [vmem:[%s4668_s25 + $0x48] ss:$16 sps:$4 sm:$0xff]   ;;  %v3773_v12 = vld [vmem:[%s4668_s25 + $0x64] ss:$16 sps:$4 sm:$0xff]   ;;  %v3775_v13 = vld [vmem:[%s4668_s25 + $0x6c] ss:$16 sps:$4 sm:$0xff]  }
  0x79   : > { %v3777_v14 = vld [vmem:[%s4668_s25 + $0x60] ss:$16 sps:$4 sm:$0xff]   ;;  %v3778_v15 = vld [vmem:[%s4668_s25 + $0x68] ss:$16 sps:$4 sm:$0xff]   ;;  %v3779_v16 = vld [vmem:[%s4668_s25 + $0x84] ss:$16 sps:$4 sm:$0xff]  }
  0x7a   : > { %2471 = vmatpush1.bf16.msra.mxu0 %v3765_v6  ;;  %2777 = vmatpush1.bf16.msra.mxu1 %v3766_v7  ;;  %v3781_v17 = vld [vmem:[%s4668_s25 + $0x8c] ss:$16 sps:$4 sm:$0xff]   ;;  %v3783_v18 = vld [vmem:[%s4668_s25 + $0x80] ss:$16 sps:$4 sm:$0xff]   ;;  %v3784_v19 = vld [vmem:[%s4668_s25 + $0x88] ss:$16 sps:$4 sm:$0xff]  }
  0x7b   : > { %2472 = vmatprep.subr.bf16.mxu0 %v3767_v8  ;;  %2778 = vmatprep.subr.bf16.mxu1 %v3769_v9  ;;  %v3785_v20 = vld [vmem:[%s4668_s25 + $0xa4] ss:$16 sps:$4 sm:$0xff]   ;;  %v3787_v21 = vld [vmem:[%s4668_s25 + $0xac] ss:$16 sps:$4 sm:$0xff]   ;;  %v3789_v22 = vld [vmem:[%s4668_s25 + $0xa0] ss:$16 sps:$4 sm:$0xff]  }
  0x7c   : > { %v3790_v23 = vld [vmem:[%s4668_s25 + $0xa8] ss:$16 sps:$4 sm:$0xff]   ;;  %v3791_v24 = vld [vmem:[%s4668_s25 + $0xc4] ss:$16 sps:$4 sm:$0xff]   ;;  %v3793_v25 = vld [vmem:[%s4668_s25 + $0xcc] ss:$16 sps:$4 sm:$0xff]  }
  0x7d   : > { %v3795_v26 = vld [vmem:[%s4668_s25 + $0xc0] ss:$16 sps:$4 sm:$0xff]   ;;  %v3796_v27 = vld [vmem:[%s4668_s25 + $0xc8] ss:$16 sps:$4 sm:$0xff]   ;;  %v3797_v28 = vld [vmem:[%s4668_s25 + $0xe4] ss:$16 sps:$4 sm:$0xff]  }
  0x7e   : > { %2473 = vmatpush1.bf16.msra.mxu0 %v3771_v10  ;;  %2779 = vmatpush1.bf16.msra.mxu1 %v3772_v11  ;;  %v3799_v29 = vld [vmem:[%s4668_s25 + $0xec] ss:$16 sps:$4 sm:$0xff]   ;;  %v3801_v30 = vld [vmem:[%s4668_s25 + $0xe0] ss:$16 sps:$4 sm:$0xff]   ;;  %v3802_v31 = vld [vmem:[%s4668_s25 + $0xe8] ss:$16 sps:$4 sm:$0xff]  }
  0x7f   : > { %2474 = vmatprep.subr.bf16.mxu0 %v3773_v12  ;;  %2780 = vmatprep.subr.bf16.mxu1 %v3775_v13  ;;  %v3803_v32 = vld [vmem:[%s4668_s25 + $0x104] ss:$16 sps:$4 sm:$0xff]   ;;  %v3805_v33 = vld [vmem:[%s4668_s25 + $0x10c] ss:$16 sps:$4 sm:$0xff]   ;;  %v3807_v34 = vld [vmem:[%s4668_s25 + $0x100] ss:$16 sps:$4 sm:$0xff]  }
  0x80   : > { %v3808_v35 = vld [vmem:[%s4668_s25 + $0x108] ss:$16 sps:$4 sm:$0xff]   ;;  %v3809_v36 = vld [vmem:[%s4668_s25 + $0x124] ss:$16 sps:$4 sm:$0xff]   ;;  %v3811_v37 = vld [vmem:[%s4668_s25 + $0x12c] ss:$16 sps:$4 sm:$0xff]  }
  0x81   : > { %v3813_v38 = vld [vmem:[%s4668_s25 + $0x120] ss:$16 sps:$4 sm:$0xff]   ;;  %v3814_v39 = vld [vmem:[%s4668_s25 + $0x128] ss:$16 sps:$4 sm:$0xff]   ;;  %v3815_v40 = vld [vmem:[%s4668_s25 + $0x144] ss:$16 sps:$4 sm:$0xff]  }
  0x82   : > { %2475 = vmatpush1.bf16.msra.mxu0 %v3777_v14  ;;  %2781 = vmatpush1.bf16.msra.mxu1 %v3778_v15  ;;  %v3817_v41 = vld [vmem:[%s4668_s25 + $0x14c] ss:$16 sps:$4 sm:$0xff]   ;;  %v3819_v42 = vld [vmem:[%s4668_s25 + $0x140] ss:$16 sps:$4 sm:$0xff]   ;;  %v3820_v43 = vld [vmem:[%s4668_s25 + $0x148] ss:$16 sps:$4 sm:$0xff]  }
  0x83   : > { %2476 = vmatprep.subr.bf16.mxu0 %v3779_v16  ;;  %2782 = vmatprep.subr.bf16.mxu1 %v3781_v17  ;;  %v3821_v44 = vld [vmem:[%s4668_s25 + $0x164] ss:$16 sps:$4 sm:$0xff]   ;;  %v3823_v45 = vld [vmem:[%s4668_s25 + $0x16c] ss:$16 sps:$4 sm:$0xff]   ;;  %v3825_v48 = vld [vmem:[%s4668_s25 + $0x160] ss:$16 sps:$4 sm:$0xff]  }
  0x84   : > { %v244_v46 = vld [vmem:[#allocation2 + $0x8] sm:$0xff]  ;;  %v3827_v51 = vld [vmem:[%s4668_s25 + $0x184] ss:$16 sps:$4 sm:$0xff]   ;;  %v3831_v53 = vld [vmem:[%s4668_s25 + $0x180] ss:$16 sps:$4 sm:$0xff]   ;;  %s3222_s30 = sshll.u32 %s4665_s23, 2 }
  0x85   : > { %v256_v47 = vld [vmem:[#allocation2 + $0x68] sm:$0xff]  ;;  %v3833_v55 = vld [vmem:[%s4668_s25 + $0x1a4] ss:$16 sps:$4 sm:$0xff]   ;;  %v3837_v57 = vld [vmem:[%s4668_s25 + $0x1a0] ss:$16 sps:$4 sm:$0xff]   ;;  %s211_s28 = scalar_lea.vmem [#allocation7], %s3222_s30 }
  0x86   : > { %2477 = vmatpush1.bf16.msra.mxu0 %v3783_v18  ;;  %2783 = vmatpush1.bf16.msra.mxu1 %v3784_v19  ;;  %v3826_v49 = vld [vmem:[%s4668_s25 + $0x168] ss:$16 sps:$4 sm:$0xff]   ;;  %v280_v50 = vpack.c.bf16 %v256_v47, %v244_v46  ;;  %v3829_v52 = vld [vmem:[%s4668_s25 + $0x18c] ss:$16 sps:$4 sm:$0xff]   ;;  %v3839_v59 = vld [vmem:[%s4668_s25 + $0x1c4] ss:$16 sps:$4 sm:$0xff]  }
  0x87   : > { %2478 = vmatprep.subr.bf16.mxu0 %v3785_v20  ;;  %2784 = vmatprep.subr.bf16.mxu1 %v3787_v21  ;;  %v3832_v54 = vld [vmem:[%s4668_s25 + $0x188] ss:$16 sps:$4 sm:$0xff]   ;;  %v3835_v56 = vld [vmem:[%s4668_s25 + $0x1ac] ss:$16 sps:$4 sm:$0xff]   ;;  %v3843_v61 = vld [vmem:[%s4668_s25 + $0x1c0] ss:$16 sps:$4 sm:$0xff]  }
  0x88   : > { %2500 = vmatprep.mubr.bf16.mxu0 %v280_v50  ;;  %2806 = vmatprep.mubr.bf16.mxu1 %v280_v50  ;;  %v3838_v58 = vld [vmem:[%s4668_s25 + $0x1a8] ss:$16 sps:$4 sm:$0xff]   ;;  %v3841_v60 = vld [vmem:[%s4668_s25 + $0x1cc] ss:$16 sps:$4 sm:$0xff]   ;;  %v3845_v63 = vld [vmem:[%s4668_s25 + $0x1e4] ss:$16 sps:$4 sm:$0xff]  }
  0x89   : > { %v3844_v62 = vld [vmem:[%s4668_s25 + $0x1c8] ss:$16 sps:$4 sm:$0xff]   ;;  %v3847_v0 = vld [vmem:[%s4668_s25 + $0x1ec] ss:$16 sps:$4 sm:$0xff]   ;;  %v3849_v1 = vld [vmem:[%s4668_s25 + $0x1e0] ss:$16 sps:$4 sm:$0xff]  }
  0x8a   : > { %2479 = vmatpush1.bf16.msra.mxu0 %v3789_v22  ;;  %2785 = vmatpush1.bf16.msra.mxu1 %v3790_v23  ;;  %v3850_v2 = vld [vmem:[%s4668_s25 + $0x1e8] ss:$16 sps:$4 sm:$0xff]   ;;  %v3853_v3 = vld [vmem:[%s4668_s25 + $0x204] ss:$16 sps:$4 sm:$0xff]   ;;  %v3856_v6 = vld [vmem:[%s4668_s25 + $0x20c] ss:$16 sps:$4 sm:$0xff]  }
  0x8b   : > { %2480 = vmatprep.subr.bf16.mxu0 %v3791_v24  ;;  %2786 = vmatprep.subr.bf16.mxu1 %v3793_v25  ;;  %v243_v4 = vld [vmem:[#allocation2] sm:$0xff]  ;;  %v3854_v8 = vld [vmem:[%s4668_s25 + $0x208] ss:$16 sps:$4 sm:$0xff]   ;;  %v3862_v11 = vld [vmem:[%s4668_s25 + $0x22c] ss:$16 sps:$4 sm:$0xff]   ;;  %s3684_s4 = smul.u32 96, %s4665_s23 }
  0x8c   : > { %v255_v5 = vld [vmem:[#allocation2 + $0x60] sm:$0xff]  ;;  %v3860_v13 = vld [vmem:[%s4668_s25 + $0x228] ss:$16 sps:$4 sm:$0xff]   ;;  %v3868_v15 = vld [vmem:[%s4668_s25 + $0x24c] ss:$16 sps:$4 sm:$0xff]   ;;  %s3589_s20 = sshll.u32 %s4562_s24, 9 }
  0x8d   : > { %v3851_v7 = vld [vmem:[%s4668_s25 + $0x200] ss:$16 sps:$4 sm:$0xff]   ;;  %v279_v9 = vpack.c.bf16 %v255_v5, %v243_v4  ;;  %v3859_v10 = vld [vmem:[%s4668_s25 + $0x224] ss:$16 sps:$4 sm:$0xff]   ;;  %v3866_v17 = vld [vmem:[%s4668_s25 + $0x248] ss:$16 sps:$4 sm:$0xff]   ;;  %s5051_s7 = scalar_lea.hbm %s5103_s3, %s3589_s20 }
  0x8e   : > { %2481 = vmatpush1.bf16.msra.mxu0 %v3795_v26  ;;  %2787 = vmatpush1.bf16.msra.mxu1 %v3796_v27  ;;  %v3857_v12 = vld [vmem:[%s4668_s25 + $0x220] ss:$16 sps:$4 sm:$0xff]   ;;  %v3865_v14 = vld [vmem:[%s4668_s25 + $0x244] ss:$16 sps:$4 sm:$0xff]   ;;  %v3874_v19 = vld [vmem:[%s4668_s25 + $0x26c] ss:$16 sps:$4 sm:$0xff]  }
  0x8f   : > { %2482 = vmatprep.subr.bf16.mxu0 %v3797_v28  ;;  %2788 = vmatprep.subr.bf16.mxu1 %v3799_v29  ;;  %v3863_v16 = vld [vmem:[%s4668_s25 + $0x240] ss:$16 sps:$4 sm:$0xff]   ;;  %v3871_v18 = vld [vmem:[%s4668_s25 + $0x264] ss:$16 sps:$4 sm:$0xff]   ;;  %v3872_v21 = vld [vmem:[%s4668_s25 + $0x268] ss:$16 sps:$4 sm:$0xff]  }
  0x90   : > { %v3869_v20 = vld [vmem:[%s4668_s25 + $0x260] ss:$16 sps:$4 sm:$0xff]   ;;  %v3877_v22 = vld [vmem:[%s4668_s25 + $0x284] ss:$16 sps:$4 sm:$0xff]   ;;  %v3880_v23 = vld [vmem:[%s4668_s25 + $0x28c] ss:$16 sps:$4 sm:$0xff]  }
  0x91   : > { %v3875_v24 = vld [vmem:[%s4668_s25 + $0x280] ss:$16 sps:$4 sm:$0xff]   ;;  %v3878_v25 = vld [vmem:[%s4668_s25 + $0x288] ss:$16 sps:$4 sm:$0xff]   ;;  %v3883_v26 = vld [vmem:[%s4668_s25 + $0x2a4] ss:$16 sps:$4 sm:$0xff]  }
  0x92   : > { %2483 = vmatpush1.bf16.msra.mxu0 %v3801_v30  ;;  %2789 = vmatpush1.bf16.msra.mxu1 %v3802_v31  ;;  %v3886_v27 = vld [vmem:[%s4668_s25 + $0x2ac] ss:$16 sps:$4 sm:$0xff]   ;;  %v268_v28 = vld [vmem:[#allocation2 + $0xc8] sm:$0x3]  ;;  %v3881_v30 = vld [vmem:[%s4668_s25 + $0x2a0] ss:$16 sps:$4 sm:$0xff]  }
  0x93   : > { %2484 = vmatprep.subr.bf16.mxu0 %v3803_v32  ;;  %2790 = vmatprep.subr.bf16.mxu1 %v3805_v33  ;;  %v292_v29 = vpack.c.bf16 %v268_v28, %v268_v28  ;;  %v3884_v31 = vld [vmem:[%s4668_s25 + $0x2a8] ss:$16 sps:$4 sm:$0xff]   ;;  %v267_v32 = vld [vmem:[#allocation2 + $0xc0] sm:$0x3]  ;;  %v3889_v33 = vld [vmem:[%s4668_s25 + $0x2c4] ss:$16 sps:$4 sm:$0xff]  }
  0x94   : > { %v3904_v46 = vld [vmem:[%s4668_s25 + $0x30c] ss:$16 sps:$4 sm:$0xff]   ;;  %v3899_v47 = vld [vmem:[%s4668_s25 + $0x300] ss:$16 sps:$4 sm:$0xff]   ;;  %v3932_v4 = vld [vmem:[%s4668_s25 + $0x3a8] ss:$16 sps:$4 sm:$0xff]  }
  0x95   : > { %v3910_v50 = vld [vmem:[%s4668_s25 + $0x32c] ss:$16 sps:$4 sm:$0xff]   ;;  %v3937_v5 = vld [vmem:[%s4668_s25 + $0x3c4] ss:$16 sps:$4 sm:$0xff]   ;;  %s5036_s17 = scalar_lea.vmem [#allocation8], %s3684_s4  ;;  %s3093_s24 = scalar_lea.sflag [#allocation4], %s4665_s23 }
  0x96   : > { %2485 = vmatpush1.bf16.msra.mxu0 %v3807_v34  ;;  %2791 = vmatpush1.bf16.msra.mxu1 %v3808_v35  ;;  %v3892_v34 = vld [vmem:[%s4668_s25 + $0x2cc] ss:$16 sps:$4 sm:$0xff]   ;;  %v291_v35 = vpack.c.bf16 %v267_v32, %v267_v32  ;;  %s3106_s5 = sshll.u32 %s5036_s17, 4  ;;  %p5124_p3 = scmp.ne.s32.totalorder %s5113_s26, 0  ;;  %s5053_s5 = int_to_ptr.vmem [resolvable:$true] %s3106_s5 }
  0x97   : > { %2486 = vmatprep.subr.bf16.mxu0 %v3809_v36  ;;  %2792 = vmatprep.subr.bf16.mxu1 %v3811_v37  ;;  %v3887_v36 = vld [vmem:[%s4668_s25 + $0x2c0] ss:$16 sps:$4 sm:$0xff]   ;;  %v3890_v37 = vld [vmem:[%s4668_s25 + $0x2c8] ss:$16 sps:$4 sm:$0xff]   ;;  %v3964_v28 = vld [vmem:[%s4668_s25 + $0x44c] ss:$16 sps:$4 sm:$0xff]  }
  0x98   : > { %v248_v32 = vld [vmem:[#allocation2 + $0x28] sm:$0xff]  ;;  %s4377_s6 = scalar_lea.vmem %s5053_s5, 1536  ;;  %s4457_s9 = smov [#allocation8]  }
  0x99   : > { %p4378_p2 = scmp.ne.s32.totalorder %s5053_s5, %s4377_s6  ;;  %s4381_s8 = sshll.u32 %s4457_s9, 4  ;;  %s4382_s8 = int_to_ptr.vmem [resolvable:$false] %s4381_s8 }
  0x9a   : > { %2487 = vmatpush1.bf16.msra.mxu0 %v3813_v38  ;;  %2793 = vmatpush1.bf16.msra.mxu1 %v3814_v39  ;;  %v246_v38 = vld [vmem:[#allocation2 + $0x18] sm:$0xff]  ;;  %s4383_s18 = scalar_lea.vmem %s4382_s8, 3072  ;;  %p4384_p12 = scmp.lt.s32.totalorder %s5053_s5, %s4382_s8 }
  0x9b   : > { %2488 = vmatprep.subr.bf16.mxu0 %v3815_v40  ;;  %2794 = vmatprep.subr.bf16.mxu1 %v3817_v41  ;;  %v258_v39 = vld [vmem:[#allocation2 + $0x78] sm:$0xff]  ;;  %v3895_v40 = vld [vmem:[%s4668_s25 + $0x2e4] ss:$16 sps:$4 sm:$0xff]   ;;  %p4379_p0 = pnand %p4378_p2, %p5124_p3  ;;  %p4385_p7 = scmp.lt.s32.totalorder %s4383_s18, %s4377_s6 }
  0x9c   : > { %v282_v41 = vpack.c.bf16 %v258_v39, %v246_v38  ;;  %v3968_v38 = vld [vmem:[%s4668_s25 + $0x468] ss:$16 sps:$4 sm:$0xff]   ;;  %v3973_v39 = vld [vmem:[%s4668_s25 + $0x484] ss:$16 sps:$4 sm:$0xff]  }
  0x9d   : > { %p4380_p10 = pneg %p4379_p0  ;;  %p4386_p4 = por %p4385_p7, %p4384_p12 }
  0x9e   : > { %2489 = vmatpush1.bf16.msra.mxu0 %v3819_v42  ;;  %2795 = vmatpush1.bf16.msra.mxu1 %v3820_v43  ;;  %v3898_v42 = vld [vmem:[%s4668_s25 + $0x2ec] ss:$16 sps:$4 sm:$0xff]   ;;  %v3893_v43 = vld [vmem:[%s4668_s25 + $0x2e0] ss:$16 sps:$4 sm:$0xff]  }
  0x9f   : > { %2490 = vmatprep.subr.bf16.mxu0 %v3821_v44  ;;  %2796 = vmatprep.subr.bf16.mxu1 %v3823_v45  ;;  %v3896_v44 = vld [vmem:[%s4668_s25 + $0x2e8] ss:$16 sps:$4 sm:$0xff]   ;;  %v3901_v45 = vld [vmem:[%s4668_s25 + $0x304] ss:$16 sps:$4 sm:$0xff]   ;;  %p4387_p6 = pnand %p4386_p4, %p4380_p10 }
  0xa2   : > { %2491 = vmatpush1.bf16.msra.mxu0 %v3825_v48  ;;  %2797 = vmatpush1.bf16.msra.mxu1 %v3826_v49  ;;  %v3902_v48 = vld [vmem:[%s4668_s25 + $0x308] ss:$16 sps:$4 sm:$0xff]   ;;  %v3907_v49 = vld [vmem:[%s4668_s25 + $0x324] ss:$16 sps:$4 sm:$0xff]  }
  0xa3   : > { %2492 = vmatprep.subr.bf16.mxu0 %v3827_v51  ;;  %2798 = vmatprep.subr.bf16.mxu1 %v3829_v52  ;;  %v3905_v51 = vld [vmem:[%s4668_s25 + $0x320] ss:$16 sps:$4 sm:$0xff]   ;;  %v3908_v52 = vld [vmem:[%s4668_s25 + $0x328] ss:$16 sps:$4 sm:$0xff]  }
  0xa6   : > { %2493 = vmatpush1.bf16.msra.mxu0 %v3831_v53  ;;  %2799 = vmatpush1.bf16.msra.mxu1 %v3832_v54  ;;  %v3913_v53 = vld [vmem:[%s4668_s25 + $0x344] ss:$16 sps:$4 sm:$0xff]   ;;  %v3916_v54 = vld [vmem:[%s4668_s25 + $0x34c] ss:$16 sps:$4 sm:$0xff]  }
  0xa7   : > { %2494 = vmatprep.subr.bf16.mxu0 %v3833_v55  ;;  %2800 = vmatprep.subr.bf16.mxu1 %v3835_v56  ;;  %v3911_v55 = vld [vmem:[%s4668_s25 + $0x340] ss:$16 sps:$4 sm:$0xff]   ;;  %v3914_v56 = vld [vmem:[%s4668_s25 + $0x348] ss:$16 sps:$4 sm:$0xff]  }
  0xaa   : > { %2495 = vmatpush1.bf16.msra.mxu0 %v3837_v57  ;;  %2801 = vmatpush1.bf16.msra.mxu1 %v3838_v58  ;;  %v3919_v57 = vld [vmem:[%s4668_s25 + $0x364] ss:$16 sps:$4 sm:$0xff]   ;;  %v3922_v58 = vld [vmem:[%s4668_s25 + $0x36c] ss:$16 sps:$4 sm:$0xff]  }
  0xab   : > { %2496 = vmatprep.subr.bf16.mxu0 %v3839_v59  ;;  %2802 = vmatprep.subr.bf16.mxu1 %v3841_v60  ;;  %v3917_v59 = vld [vmem:[%s4668_s25 + $0x360] ss:$16 sps:$4 sm:$0xff]   ;;  %v3920_v60 = vld [vmem:[%s4668_s25 + $0x368] ss:$16 sps:$4 sm:$0xff]  }
  0xae   : > { %2497 = vmatpush1.bf16.msra.mxu0 %v3843_v61  ;;  %2803 = vmatpush1.bf16.msra.mxu1 %v3844_v62  ;;  %v3925_v61 = vld [vmem:[%s4668_s25 + $0x384] ss:$16 sps:$4 sm:$0xff]   ;;  %v3928_v62 = vld [vmem:[%s4668_s25 + $0x38c] ss:$16 sps:$4 sm:$0xff]  }
  0xaf   : > { %2498 = vmatprep.subr.bf16.mxu0 %v3845_v63  ;;  %2804 = vmatprep.subr.bf16.mxu1 %v3847_v0  ;;  %v3923_v63 = vld [vmem:[%s4668_s25 + $0x380] ss:$16 sps:$4 sm:$0xff]   ;;  %v3926_v0 = vld [vmem:[%s4668_s25 + $0x388] ss:$16 sps:$4 sm:$0xff]  }
  0xb2   : > { %2499 = vmatpush1.bf16.msra.mxu0 %v3849_v1  ;;  %2805 = vmatpush1.bf16.msra.mxu1 %v3850_v2  ;;  %v3931_v1 = vld [vmem:[%s4668_s25 + $0x3a4] ss:$16 sps:$4 sm:$0xff]   ;;  %v3934_v2 = vld [vmem:[%s4668_s25 + $0x3ac] ss:$16 sps:$4 sm:$0xff]  }
  0xb3   : > { %2519 = vmatprep.subr.bf16.mxu0 %v3853_v3  ;;  %2825 = vmatprep.subr.bf16.mxu1 %v3856_v6  ;;  %v3929_v3 = vld [vmem:[%s4668_s25 + $0x3a0] ss:$16 sps:$4 sm:$0xff]   ;;  %v3940_v6 = vld [vmem:[%s4668_s25 + $0x3cc] ss:$16 sps:$4 sm:$0xff]  }
  0xb5   : > { %2501 = vmatmul.mubr.bf16.vlgmr.msra.gmra.mrb[0].mxu0 %v279_v9  ;;  %2807 = vmatmul.mubr.bf16.vlgmr.msra.gmra.mrb[0].mxu1 %v279_v9  ;;  %v3943_v9 = vld [vmem:[%s4668_s25 + $0x3e4] ss:$16 sps:$4 sm:$0xff]  }
  0xb6   : > { %2520 = vmatpush1.bf16.msra.mxu0 %v3851_v7  ;;  %2826 = vmatpush1.bf16.msra.mxu1 %v3854_v8  ;;  %v3935_v7 = vld [vmem:[%s4668_s25 + $0x3c0] ss:$16 sps:$4 sm:$0xff]   ;;  %v3938_v8 = vld [vmem:[%s4668_s25 + $0x3c8] ss:$16 sps:$4 sm:$0xff]  }
  0xb7   : > { %2521 = vmatprep.subr.bf16.mxu0 %v3859_v10  ;;  %2827 = vmatprep.subr.bf16.mxu1 %v3862_v11  ;;  %v3946_v10 = vld [vmem:[%s4668_s25 + $0x3ec] ss:$16 sps:$4 sm:$0xff]   ;;  %v3941_v11 = vld [vmem:[%s4668_s25 + $0x3e0] ss:$16 sps:$4 sm:$0xff]  }
  0xb8   : > { %2510 = vmatprep.mubr.bf16.mxu0 %v292_v29  ;;  %2816 = vmatprep.mubr.bf16.mxu1 %v292_v29  ;;  %v3959_v29 = vld [vmem:[%s4668_s25 + $0x440] ss:$16 sps:$4 sm:$0xff]  }
  0xba   : > { %2522 = vmatpush1.bf16.msra.mxu0 %v3857_v12  ;;  %2828 = vmatpush1.bf16.msra.mxu1 %v3860_v13  ;;  %v3944_v12 = vld [vmem:[%s4668_s25 + $0x3e8] ss:$16 sps:$4 sm:$0xff]   ;;  %v245_v13 = vld [vmem:[#allocation2 + $0x10] sm:$0xff] }
  0xbb   : > { %2523 = vmatprep.subr.bf16.mxu0 %v3865_v14  ;;  %2829 = vmatprep.subr.bf16.mxu1 %v3868_v15  ;;  %v257_v14 = vld [vmem:[#allocation2 + $0x70] sm:$0xff] }
  0xbc   : > { %v3949_v15 = vld [vmem:[%s4668_s25 + $0x404] ss:$16 sps:$4 sm:$0xff]  }
  0xbd   : > { %2511 = vmatmul.mubr.bf16.gmra.mrb[4].mxu0 %v291_v35  ;;  %2817 = vmatmul.mubr.bf16.gmra.mrb[4].mxu1 %v291_v35  ;;  %v3970_v35 = vld [vmem:[%s4668_s25 + $0x46c] ss:$16 sps:$4 sm:$0xff]  }
  0xbe   : > { %2524 = vmatpush1.bf16.msra.mxu0 %v3863_v16  ;;  %2830 = vmatpush1.bf16.msra.mxu1 %v3866_v17  ;;  %v3952_v16 = vld [vmem:[%s4668_s25 + $0x40c] ss:$16 sps:$4 sm:$0xff]   ;;  %v3947_v17 = vld [vmem:[%s4668_s25 + $0x400] ss:$16 sps:$4 sm:$0xff]  }
  0xbf   : > { %2525 = vmatprep.subr.bf16.mxu0 %v3871_v18  ;;  %2831 = vmatprep.subr.bf16.mxu1 %v3874_v19  ;;  %v281_v18 = vpack.c.bf16 %v257_v14, %v245_v13  ;;  %v270_v19 = vld [vmem:[#allocation2 + $0xd8] sm:$0x3]  ;;  %v4025_v13 = vld [vmem:[%s4668_s25 + $0x5a0] ss:$16 sps:$4 sm:$0xff]  }
  0xc0   : > { %2551 = vmatprep.mubr.bf16.mxu0 %v282_v41  ;;  %2857 = vmatprep.mubr.bf16.mxu1 %v282_v41  ;;  %v3971_v41 = vld [vmem:[%s4668_s25 + $0x480] ss:$16 sps:$4 sm:$0xff]   ;;  %v4028_v14 = vld [vmem:[%s4668_s25 + $0x5a8] ss:$16 sps:$4 sm:$0xff]  }
  0xc2   : > { %2526 = vmatpush1.bf16.msra.mxu0 %v3869_v20  ;;  %2832 = vmatpush1.bf16.msra.mxu1 %v3872_v21  ;;  %v3950_v20 = vld [vmem:[%s4668_s25 + $0x408] ss:$16 sps:$4 sm:$0xff]   ;;  %v3955_v21 = vld [vmem:[%s4668_s25 + $0x424] ss:$16 sps:$4 sm:$0xff]  }
  0xc3   : > { %2527 = vmatprep.subr.bf16.mxu0 %v3877_v22  ;;  %2833 = vmatprep.subr.bf16.mxu1 %v3880_v23  ;;  %v3958_v22 = vld [vmem:[%s4668_s25 + $0x42c] ss:$16 sps:$4 sm:$0xff]   ;;  %v294_v23 = vpack.c.bf16 %v270_v19, %v270_v19  ;;  %v4039_v19 = vld [vmem:[%s4668_s25 + $0x5e4] ss:$16 sps:$4 sm:$0xff]  }
  0xc6   : > { %2528 = vmatpush1.bf16.msra.mxu0 %v3875_v24  ;;  %2834 = vmatpush1.bf16.msra.mxu1 %v3878_v25  ;;  %v3953_v24 = vld [vmem:[%s4668_s25 + $0x420] ss:$16 sps:$4 sm:$0xff]   ;;  %v3956_v25 = vld [vmem:[%s4668_s25 + $0x428] ss:$16 sps:$4 sm:$0xff]  }
  0xc7   : > { %2529 = vmatprep.subr.bf16.mxu0 %v3883_v26  ;;  %2835 = vmatprep.subr.bf16.mxu1 %v3886_v27  ;;  %v269_v26 = vld [vmem:[#allocation2 + $0xd0] sm:$0x3]  ;;  %v3961_v27 = vld [vmem:[%s4668_s25 + $0x444] ss:$16 sps:$4 sm:$0xff]  }
  0xca   : > { %2530 = vmatpush1.bf16.msra.mxu0 %v3881_v30  ;;  %2836 = vmatpush1.bf16.msra.mxu1 %v3884_v31  ;;  %v3962_v30 = vld [vmem:[%s4668_s25 + $0x448] ss:$16 sps:$4 sm:$0xff]   ;;  %v293_v31 = vpack.c.bf16 %v269_v26, %v269_v26  ;;  %v4048_v26 = vld [vmem:[%s4668_s25 + $0x60c] ss:$16 sps:$4 sm:$0xff]  }
  0xcb   : > { %2531 = vmatprep.subr.bf16.mxu0 %v3889_v33  ;;  %2837 = vmatprep.subr.bf16.mxu1 %v3892_v34  ;;  %v260_v33 = vld [vmem:[#allocation2 + $0x88] sm:$0xff]  ;;  %v3967_v34 = vld [vmem:[%s4668_s25 + $0x464] ss:$16 sps:$4 sm:$0xff]  }
  0xce   : > { %2532 = vmatpush1.bf16.msra.mxu0 %v3887_v36  ;;  %2838 = vmatpush1.bf16.msra.mxu1 %v3890_v37  ;;  %v284_v36 = vpack.c.bf16 %v260_v33, %v248_v32  ;;  %v3965_v37 = vld [vmem:[%s4668_s25 + $0x460] ss:$16 sps:$4 sm:$0xff]   ;;  %v4054_v32 = vld [vmem:[%s4668_s25 + $0x62c] ss:$16 sps:$4 sm:$0xff]  }
  0xcf   : > { %2533 = vmatprep.subr.bf16.mxu0 %v3895_v40  ;;  %2839 = vmatprep.subr.bf16.mxu1 %v3898_v42  ;;  %v3976_v40 = vld [vmem:[%s4668_s25 + $0x48c] ss:$16 sps:$4 sm:$0xff]   ;;  %v3974_v42 = vld [vmem:[%s4668_s25 + $0x488] ss:$16 sps:$4 sm:$0xff]  }
  0xd2   : > { %2534 = vmatpush1.bf16.msra.mxu0 %v3893_v43  ;;  %2840 = vmatpush1.bf16.msra.mxu1 %v3896_v44  ;;  %v3979_v43 = vld [vmem:[%s4668_s25 + $0x4a4] ss:$16 sps:$4 sm:$0xff]   ;;  %v3982_v44 = vld [vmem:[%s4668_s25 + $0x4ac] ss:$16 sps:$4 sm:$0xff]  }
  0xd3   : > { %2535 = vmatprep.subr.bf16.mxu0 %v3901_v45  ;;  %2841 = vmatprep.subr.bf16.mxu1 %v3904_v46  ;;  %v3977_v45 = vld [vmem:[%s4668_s25 + $0x4a0] ss:$16 sps:$4 sm:$0xff]   ;;  %v3980_v46 = vld [vmem:[%s4668_s25 + $0x4a8] ss:$16 sps:$4 sm:$0xff]  }
  0xd6   : > { %2536 = vmatpush1.bf16.msra.mxu0 %v3899_v47  ;;  %2842 = vmatpush1.bf16.msra.mxu1 %v3902_v48  ;;  %v3985_v47 = vld [vmem:[%s4668_s25 + $0x4c4] ss:$16 sps:$4 sm:$0xff]   ;;  %v3988_v48 = vld [vmem:[%s4668_s25 + $0x4cc] ss:$16 sps:$4 sm:$0xff]  }
  0xd7   : > { %2537 = vmatprep.subr.bf16.mxu0 %v3907_v49  ;;  %2843 = vmatprep.subr.bf16.mxu1 %v3910_v50  ;;  %v3983_v49 = vld [vmem:[%s4668_s25 + $0x4c0] ss:$16 sps:$4 sm:$0xff]   ;;  %v3986_v50 = vld [vmem:[%s4668_s25 + $0x4c8] ss:$16 sps:$4 sm:$0xff]  }
  0xda   : > { %2538 = vmatpush1.bf16.msra.mxu0 %v3905_v51  ;;  %2844 = vmatpush1.bf16.msra.mxu1 %v3908_v52  ;;  %v3991_v51 = vld [vmem:[%s4668_s25 + $0x4e4] ss:$16 sps:$4 sm:$0xff]   ;;  %v3994_v52 = vld [vmem:[%s4668_s25 + $0x4ec] ss:$16 sps:$4 sm:$0xff]  }
  0xdb   : > { %2539 = vmatprep.subr.bf16.mxu0 %v3913_v53  ;;  %2845 = vmatprep.subr.bf16.mxu1 %v3916_v54  ;;  %v3989_v53 = vld [vmem:[%s4668_s25 + $0x4e0] ss:$16 sps:$4 sm:$0xff]   ;;  %v3992_v54 = vld [vmem:[%s4668_s25 + $0x4e8] ss:$16 sps:$4 sm:$0xff]  }
  0xde   : > { %2540 = vmatpush1.bf16.msra.mxu0 %v3911_v55  ;;  %2846 = vmatpush1.bf16.msra.mxu1 %v3914_v56  ;;  %v3997_v55 = vld [vmem:[%s4668_s25 + $0x504] ss:$16 sps:$4 sm:$0xff]   ;;  %v4000_v56 = vld [vmem:[%s4668_s25 + $0x50c] ss:$16 sps:$4 sm:$0xff]  }
  0xdf   : > { %2541 = vmatprep.subr.bf16.mxu0 %v3919_v57  ;;  %2847 = vmatprep.subr.bf16.mxu1 %v3922_v58  ;;  %v3995_v57 = vld [vmem:[%s4668_s25 + $0x500] ss:$16 sps:$4 sm:$0xff]   ;;  %v3998_v58 = vld [vmem:[%s4668_s25 + $0x508] ss:$16 sps:$4 sm:$0xff]  }
  0xe2   : > { %2542 = vmatpush1.bf16.msra.mxu0 %v3917_v59  ;;  %2848 = vmatpush1.bf16.msra.mxu1 %v3920_v60  ;;  %v4003_v59 = vld [vmem:[%s4668_s25 + $0x524] ss:$16 sps:$4 sm:$0xff]   ;;  %v4006_v60 = vld [vmem:[%s4668_s25 + $0x52c] ss:$16 sps:$4 sm:$0xff]  }
  0xe3   : > { %2543 = vmatprep.subr.bf16.mxu0 %v3925_v61  ;;  %2849 = vmatprep.subr.bf16.mxu1 %v3928_v62  ;;  %v4001_v61 = vld [vmem:[%s4668_s25 + $0x520] ss:$16 sps:$4 sm:$0xff]   ;;  %v4004_v62 = vld [vmem:[%s4668_s25 + $0x528] ss:$16 sps:$4 sm:$0xff]  }
  0xe6   : > { %2544 = vmatpush1.bf16.msra.mxu0 %v3923_v63  ;;  %2850 = vmatpush1.bf16.msra.mxu1 %v3926_v0  ;;  %v4009_v63 = vld [vmem:[%s4668_s25 + $0x544] ss:$16 sps:$4 sm:$0xff]   ;;  %v4012_v0 = vld [vmem:[%s4668_s25 + $0x54c] ss:$16 sps:$4 sm:$0xff]  }
  0xe7   : > { %2545 = vmatprep.subr.bf16.mxu0 %v3931_v1  ;;  %2851 = vmatprep.subr.bf16.mxu1 %v3934_v2  ;;  %v4007_v1 = vld [vmem:[%s4668_s25 + $0x540] ss:$16 sps:$4 sm:$0xff]   ;;  %v4010_v2 = vld [vmem:[%s4668_s25 + $0x548] ss:$16 sps:$4 sm:$0xff]  }
  0xea   : > { %2546 = vmatpush1.bf16.msra.mxu0 %v3929_v3  ;;  %2852 = vmatpush1.bf16.msra.mxu1 %v3932_v4  ;;  %v4015_v3 = vld [vmem:[%s4668_s25 + $0x564] ss:$16 sps:$4 sm:$0xff]   ;;  %v4018_v4 = vld [vmem:[%s4668_s25 + $0x56c] ss:$16 sps:$4 sm:$0xff]  }
  0xeb   : > { %2547 = vmatprep.subr.bf16.mxu0 %v3937_v5  ;;  %2853 = vmatprep.subr.bf16.mxu1 %v3940_v6  ;;  %v4013_v5 = vld [vmem:[%s4668_s25 + $0x560] ss:$16 sps:$4 sm:$0xff]   ;;  %v4016_v6 = vld [vmem:[%s4668_s25 + $0x568] ss:$16 sps:$4 sm:$0xff]  }
  0xee   : > { %2548 = vmatpush1.bf16.msra.mxu0 %v3935_v7  ;;  %2854 = vmatpush1.bf16.msra.mxu1 %v3938_v8  ;;  %v4021_v7 = vld [vmem:[%s4668_s25 + $0x584] ss:$16 sps:$4 sm:$0xff]   ;;  %v4024_v8 = vld [vmem:[%s4668_s25 + $0x58c] ss:$16 sps:$4 sm:$0xff]  }
  0xef   : > { %2549 = vmatprep.subr.bf16.mxu0 %v3943_v9  ;;  %2855 = vmatprep.subr.bf16.mxu1 %v3946_v10  ;;  %v4019_v9 = vld [vmem:[%s4668_s25 + $0x580] ss:$16 sps:$4 sm:$0xff]   ;;  %v4022_v10 = vld [vmem:[%s4668_s25 + $0x588] ss:$16 sps:$4 sm:$0xff]  }
  0xf2   : > { %2550 = vmatpush1.bf16.msra.mxu0 %v3941_v11  ;;  %2856 = vmatpush1.bf16.msra.mxu1 %v3944_v12  ;;  %v4027_v11 = vld [vmem:[%s4668_s25 + $0x5a4] ss:$16 sps:$4 sm:$0xff]   ;;  %v4030_v12 = vld [vmem:[%s4668_s25 + $0x5ac] ss:$16 sps:$4 sm:$0xff]  }
  0xf3   : > { %2570 = vmatprep.subr.bf16.mxu0 %v3949_v15  ;;  %2876 = vmatprep.subr.bf16.mxu1 %v3952_v16  ;;  %v4033_v15 = vld [vmem:[%s4668_s25 + $0x5c4] ss:$16 sps:$4 sm:$0xff]   ;;  %v4036_v16 = vld [vmem:[%s4668_s25 + $0x5cc] ss:$16 sps:$4 sm:$0xff]  }
  0xf5   : > { %2552 = vmatmul.mubr.bf16.vlgmr.msra.gmra.mrb[0].mxu0 %v281_v18  ;;  %2858 = vmatmul.mubr.bf16.vlgmr.msra.gmra.mrb[0].mxu1 %v281_v18  ;;  %v4034_v18 = vld [vmem:[%s4668_s25 + $0x5c8] ss:$16 sps:$4 sm:$0xff]  }
  0xf6   : > { %2571 = vmatpush1.bf16.msra.mxu0 %v3947_v17  ;;  %2877 = vmatpush1.bf16.msra.mxu1 %v3950_v20  ;;  %v4031_v17 = vld [vmem:[%s4668_s25 + $0x5c0] ss:$16 sps:$4 sm:$0xff]   ;;  %v4042_v20 = vld [vmem:[%s4668_s25 + $0x5ec] ss:$16 sps:$4 sm:$0xff]  }
  0xf7   : > { %2572 = vmatprep.subr.bf16.mxu0 %v3955_v21  ;;  %2878 = vmatprep.subr.bf16.mxu1 %v3958_v22  ;;  %v4037_v21 = vld [vmem:[%s4668_s25 + $0x5e0] ss:$16 sps:$4 sm:$0xff]   ;;  %v4040_v22 = vld [vmem:[%s4668_s25 + $0x5e8] ss:$16 sps:$4 sm:$0xff]  }
  0xf8   : > { %2561 = vmatprep.mubr.bf16.mxu0 %v294_v23  ;;  %2867 = vmatprep.mubr.bf16.mxu1 %v294_v23  ;;  %v247_v23 = vld [vmem:[#allocation2 + $0x20] sm:$0xff] }
  0xfa   : > { %2573 = vmatpush1.bf16.msra.mxu0 %v3953_v24  ;;  %2879 = vmatpush1.bf16.msra.mxu1 %v3956_v25  ;;  %v259_v24 = vld [vmem:[#allocation2 + $0x80] sm:$0xff] }
  0xfb   : > { %2574 = vmatprep.subr.bf16.mxu0 %v3961_v27  ;;  %2880 = vmatprep.subr.bf16.mxu1 %v3964_v28  ;;  %v4045_v25 = vld [vmem:[%s4668_s25 + $0x604] ss:$16 sps:$4 sm:$0xff]   ;;  %v283_v27 = vpack.c.bf16 %v259_v24, %v247_v23  ;;  %v272_v28 = vld [vmem:[#allocation2 + $0xe8] sm:$0x3]  ;;  %v4121_v23 = vld [vmem:[%s4668_s25 + $0x7a0] ss:$16 sps:$4 sm:$0xff]  }
  0xfc   : > { %v296_v33 = vpack.c.bf16 %v272_v28, %v272_v28  ;;  %v4124_v24 = vld [vmem:[%s4668_s25 + $0x7a8] ss:$16 sps:$4 sm:$0xff]  }
  0xfd   : > { %2562 = vmatmul.mubr.bf16.gmra.mrb[4].mxu0 %v293_v31  ;;  %2868 = vmatmul.mubr.bf16.gmra.mrb[4].mxu1 %v293_v31  ;;  %v4051_v31 = vld [vmem:[%s4668_s25 + $0x624] ss:$16 sps:$4 sm:$0xff]   ;;  %v4130_v28 = vld [vmem:[%s4668_s25 + $0x7c8] ss:$16 sps:$4 sm:$0xff]  }
  0xfe   : > { %2575 = vmatpush1.bf16.msra.mxu0 %v3959_v29  ;;  %2881 = vmatpush1.bf16.msra.mxu1 %v3962_v30  ;;  %v4043_v29 = vld [vmem:[%s4668_s25 + $0x600] ss:$16 sps:$4 sm:$0xff]   ;;  %v4046_v30 = vld [vmem:[%s4668_s25 + $0x608] ss:$16 sps:$4 sm:$0xff]  }
  0xff   : > { %2576 = vmatprep.subr.bf16.mxu0 %v3967_v34  ;;  %2882 = vmatprep.subr.bf16.mxu1 %v3970_v35  ;;  %v4049_v34 = vld [vmem:[%s4668_s25 + $0x620] ss:$16 sps:$4 sm:$0xff]   ;;  %v4052_v35 = vld [vmem:[%s4668_s25 + $0x628] ss:$16 sps:$4 sm:$0xff]  }
 0x100   : > { %2602 = vmatprep.mubr.bf16.mxu0 %v284_v36  ;;  %2908 = vmatprep.mubr.bf16.mxu1 %v284_v36  ;;  %v271_v36 = vld [vmem:[#allocation2 + $0xe0] sm:$0x3] }
 0x102   : > { %2577 = vmatpush1.bf16.msra.mxu0 %v3965_v37  ;;  %2883 = vmatpush1.bf16.msra.mxu1 %v3968_v38  ;;  %v4057_v37 = vld [vmem:[%s4668_s25 + $0x644] ss:$16 sps:$4 sm:$0xff]   ;;  %v4060_v38 = vld [vmem:[%s4668_s25 + $0x64c] ss:$16 sps:$4 sm:$0xff]  }
 0x103   : > { %2578 = vmatprep.subr.bf16.mxu0 %v3973_v39  ;;  %2884 = vmatprep.subr.bf16.mxu1 %v3976_v40  ;;  %v250_v39 = vld [vmem:[#allocation2 + $0x38] sm:$0xff]  ;;  %v295_v40 = vpack.c.bf16 %v271_v36, %v271_v36 }
 0x104   : > { %v4144_v36 = vld [vmem:[%s4668_s25 + $0x80c] ss:$16 sps:$4 sm:$0xff]  }
 0x106   : > { %2579 = vmatpush1.bf16.msra.mxu0 %v3971_v41  ;;  %2885 = vmatpush1.bf16.msra.mxu1 %v3974_v42  ;;  %v262_v41 = vld [vmem:[#allocation2 + $0x98] sm:$0xff]  ;;  %v4055_v42 = vld [vmem:[%s4668_s25 + $0x640] ss:$16 sps:$4 sm:$0xff]  }
 0x107   : > { %2580 = vmatprep.subr.bf16.mxu0 %v3979_v43  ;;  %2886 = vmatprep.subr.bf16.mxu1 %v3982_v44  ;;  %v4058_v43 = vld [vmem:[%s4668_s25 + $0x648] ss:$16 sps:$4 sm:$0xff]   ;;  %v4063_v44 = vld [vmem:[%s4668_s25 + $0x664] ss:$16 sps:$4 sm:$0xff]  }
 0x10a   : > { %2581 = vmatpush1.bf16.msra.mxu0 %v3977_v45  ;;  %2887 = vmatpush1.bf16.msra.mxu1 %v3980_v46  ;;  %v4066_v45 = vld [vmem:[%s4668_s25 + $0x66c] ss:$16 sps:$4 sm:$0xff]   ;;  %v286_v46 = vpack.c.bf16 %v262_v41, %v250_v39  ;;  %v4139_v39 = vld [vmem:[%s4668_s25 + $0x800] ss:$16 sps:$4 sm:$0xff]   ;;  %v4147_v41 = vld [vmem:[%s4668_s25 + $0x824] ss:$16 sps:$4 sm:$0xff]  }
 0x10b   : > { %2582 = vmatprep.subr.bf16.mxu0 %v3985_v47  ;;  %2888 = vmatprep.subr.bf16.mxu1 %v3988_v48  ;;  %v4061_v47 = vld [vmem:[%s4668_s25 + $0x660] ss:$16 sps:$4 sm:$0xff]   ;;  %v4064_v48 = vld [vmem:[%s4668_s25 + $0x668] ss:$16 sps:$4 sm:$0xff]  }
 0x10e   : > { %2583 = vmatpush1.bf16.msra.mxu0 %v3983_v49  ;;  %2889 = vmatpush1.bf16.msra.mxu1 %v3986_v50  ;;  %v4069_v49 = vld [vmem:[%s4668_s25 + $0x684] ss:$16 sps:$4 sm:$0xff]   ;;  %v4072_v50 = vld [vmem:[%s4668_s25 + $0x68c] ss:$16 sps:$4 sm:$0xff]  }
 0x10f   : > { %2584 = vmatprep.subr.bf16.mxu0 %v3991_v51  ;;  %2890 = vmatprep.subr.bf16.mxu1 %v3994_v52  ;;  %v4067_v51 = vld [vmem:[%s4668_s25 + $0x680] ss:$16 sps:$4 sm:$0xff]   ;;  %v4070_v52 = vld [vmem:[%s4668_s25 + $0x688] ss:$16 sps:$4 sm:$0xff]  }
 0x112   : > { %2585 = vmatpush1.bf16.msra.mxu0 %v3989_v53  ;;  %2891 = vmatpush1.bf16.msra.mxu1 %v3992_v54  ;;  %v4075_v53 = vld [vmem:[%s4668_s25 + $0x6a4] ss:$16 sps:$4 sm:$0xff]   ;;  %v4078_v54 = vld [vmem:[%s4668_s25 + $0x6ac] ss:$16 sps:$4 sm:$0xff]  }
 0x113   : > { %2586 = vmatprep.subr.bf16.mxu0 %v3997_v55  ;;  %2892 = vmatprep.subr.bf16.mxu1 %v4000_v56  ;;  %v4073_v55 = vld [vmem:[%s4668_s25 + $0x6a0] ss:$16 sps:$4 sm:$0xff]   ;;  %v4076_v56 = vld [vmem:[%s4668_s25 + $0x6a8] ss:$16 sps:$4 sm:$0xff]  }
 0x116   : > { %2587 = vmatpush1.bf16.msra.mxu0 %v3995_v57  ;;  %2893 = vmatpush1.bf16.msra.mxu1 %v3998_v58  ;;  %v4081_v57 = vld [vmem:[%s4668_s25 + $0x6c4] ss:$16 sps:$4 sm:$0xff]   ;;  %v4084_v58 = vld [vmem:[%s4668_s25 + $0x6cc] ss:$16 sps:$4 sm:$0xff]  }
 0x117   : > { %2588 = vmatprep.subr.bf16.mxu0 %v4003_v59  ;;  %2894 = vmatprep.subr.bf16.mxu1 %v4006_v60  ;;  %v4079_v59 = vld [vmem:[%s4668_s25 + $0x6c0] ss:$16 sps:$4 sm:$0xff]   ;;  %v4082_v60 = vld [vmem:[%s4668_s25 + $0x6c8] ss:$16 sps:$4 sm:$0xff]  }
 0x11a   : > { %2589 = vmatpush1.bf16.msra.mxu0 %v4001_v61  ;;  %2895 = vmatpush1.bf16.msra.mxu1 %v4004_v62  ;;  %v4087_v61 = vld [vmem:[%s4668_s25 + $0x6e4] ss:$16 sps:$4 sm:$0xff]   ;;  %v4090_v62 = vld [vmem:[%s4668_s25 + $0x6ec] ss:$16 sps:$4 sm:$0xff]  }
 0x11b   : > { %2590 = vmatprep.subr.bf16.mxu0 %v4009_v63  ;;  %2896 = vmatprep.subr.bf16.mxu1 %v4012_v0  ;;  %v4085_v63 = vld [vmem:[%s4668_s25 + $0x6e0] ss:$16 sps:$4 sm:$0xff]   ;;  %v4088_v0 = vld [vmem:[%s4668_s25 + $0x6e8] ss:$16 sps:$4 sm:$0xff]  }
 0x11e   : > { %2591 = vmatpush1.bf16.msra.mxu0 %v4007_v1  ;;  %2897 = vmatpush1.bf16.msra.mxu1 %v4010_v2  ;;  %v4093_v1 = vld [vmem:[%s4668_s25 + $0x704] ss:$16 sps:$4 sm:$0xff]   ;;  %v4096_v2 = vld [vmem:[%s4668_s25 + $0x70c] ss:$16 sps:$4 sm:$0xff]  }
 0x11f   : > { %2592 = vmatprep.subr.bf16.mxu0 %v4015_v3  ;;  %2898 = vmatprep.subr.bf16.mxu1 %v4018_v4  ;;  %v4091_v3 = vld [vmem:[%s4668_s25 + $0x700] ss:$16 sps:$4 sm:$0xff]   ;;  %v4094_v4 = vld [vmem:[%s4668_s25 + $0x708] ss:$16 sps:$4 sm:$0xff]  }
 0x122   : > { %2593 = vmatpush1.bf16.msra.mxu0 %v4013_v5  ;;  %2899 = vmatpush1.bf16.msra.mxu1 %v4016_v6  ;;  %v4099_v5 = vld [vmem:[%s4668_s25 + $0x724] ss:$16 sps:$4 sm:$0xff]   ;;  %v4102_v6 = vld [vmem:[%s4668_s25 + $0x72c] ss:$16 sps:$4 sm:$0xff]  }
 0x123   : > { %2594 = vmatprep.subr.bf16.mxu0 %v4021_v7  ;;  %2900 = vmatprep.subr.bf16.mxu1 %v4024_v8  ;;  %v4097_v7 = vld [vmem:[%s4668_s25 + $0x720] ss:$16 sps:$4 sm:$0xff]   ;;  %v4100_v8 = vld [vmem:[%s4668_s25 + $0x728] ss:$16 sps:$4 sm:$0xff]  }
 0x126   : > { %2595 = vmatpush1.bf16.msra.mxu0 %v4019_v9  ;;  %2901 = vmatpush1.bf16.msra.mxu1 %v4022_v10  ;;  %v4105_v9 = vld [vmem:[%s4668_s25 + $0x744] ss:$16 sps:$4 sm:$0xff]   ;;  %v4108_v10 = vld [vmem:[%s4668_s25 + $0x74c] ss:$16 sps:$4 sm:$0xff]  }
 0x127   : > { %2596 = vmatprep.subr.bf16.mxu0 %v4027_v11  ;;  %2902 = vmatprep.subr.bf16.mxu1 %v4030_v12  ;;  %v4103_v11 = vld [vmem:[%s4668_s25 + $0x740] ss:$16 sps:$4 sm:$0xff]   ;;  %v4106_v12 = vld [vmem:[%s4668_s25 + $0x748] ss:$16 sps:$4 sm:$0xff]  }
 0x12a   : > { %2597 = vmatpush1.bf16.msra.mxu0 %v4025_v13  ;;  %2903 = vmatpush1.bf16.msra.mxu1 %v4028_v14  ;;  %v4111_v13 = vld [vmem:[%s4668_s25 + $0x764] ss:$16 sps:$4 sm:$0xff]   ;;  %v4114_v14 = vld [vmem:[%s4668_s25 + $0x76c] ss:$16 sps:$4 sm:$0xff]  }
 0x12b   : > { %2598 = vmatprep.subr.bf16.mxu0 %v4033_v15  ;;  %2904 = vmatprep.subr.bf16.mxu1 %v4036_v16  ;;  %v4109_v15 = vld [vmem:[%s4668_s25 + $0x760] ss:$16 sps:$4 sm:$0xff]   ;;  %v4112_v16 = vld [vmem:[%s4668_s25 + $0x768] ss:$16 sps:$4 sm:$0xff]  }
 0x12e   : > { %2599 = vmatpush1.bf16.msra.mxu0 %v4031_v17  ;;  %2905 = vmatpush1.bf16.msra.mxu1 %v4034_v18  ;;  %v4117_v17 = vld [vmem:[%s4668_s25 + $0x784] ss:$16 sps:$4 sm:$0xff]   ;;  %v4120_v18 = vld [vmem:[%s4668_s25 + $0x78c] ss:$16 sps:$4 sm:$0xff]  }
 0x12f   : > { %2600 = vmatprep.subr.bf16.mxu0 %v4039_v19  ;;  %2906 = vmatprep.subr.bf16.mxu1 %v4042_v20  ;;  %v4115_v19 = vld [vmem:[%s4668_s25 + $0x780] ss:$16 sps:$4 sm:$0xff]   ;;  %v4118_v20 = vld [vmem:[%s4668_s25 + $0x788] ss:$16 sps:$4 sm:$0xff]  }
 0x132   : > { %2601 = vmatpush1.bf16.msra.mxu0 %v4037_v21  ;;  %2907 = vmatpush1.bf16.msra.mxu1 %v4040_v22  ;;  %v4123_v21 = vld [vmem:[%s4668_s25 + $0x7a4] ss:$16 sps:$4 sm:$0xff]   ;;  %v4126_v22 = vld [vmem:[%s4668_s25 + $0x7ac] ss:$16 sps:$4 sm:$0xff]  }
 0x133   : > { %2621 = vmatprep.subr.bf16.mxu0 %v4045_v25  ;;  %2927 = vmatprep.subr.bf16.mxu1 %v4048_v26  ;;  %v4129_v25 = vld [vmem:[%s4668_s25 + $0x7c4] ss:$16 sps:$4 sm:$0xff]   ;;  %v4132_v26 = vld [vmem:[%s4668_s25 + $0x7cc] ss:$16 sps:$4 sm:$0xff]  }
 0x135   : > { %2603 = vmatmul.mubr.bf16.vlgmr.msra.gmra.mrb[0].mxu0 %v283_v27  ;;  %2909 = vmatmul.mubr.bf16.vlgmr.msra.gmra.mrb[0].mxu1 %v283_v27  ;;  %v4127_v27 = vld [vmem:[%s4668_s25 + $0x7c0] ss:$16 sps:$4 sm:$0xff]  }
 0x136   : > { %2622 = vmatpush1.bf16.msra.mxu0 %v4043_v29  ;;  %2928 = vmatpush1.bf16.msra.mxu1 %v4046_v30  ;;  %v4135_v29 = vld [vmem:[%s4668_s25 + $0x7e4] ss:$16 sps:$4 sm:$0xff]   ;;  %v4138_v30 = vld [vmem:[%s4668_s25 + $0x7ec] ss:$16 sps:$4 sm:$0xff]  }
 0x137   : > { %2623 = vmatprep.subr.bf16.mxu0 %v4051_v31  ;;  %2929 = vmatprep.subr.bf16.mxu1 %v4054_v32  ;;  %v4133_v31 = vld [vmem:[%s4668_s25 + $0x7e0] ss:$16 sps:$4 sm:$0xff]   ;;  %v4136_v32 = vld [vmem:[%s4668_s25 + $0x7e8] ss:$16 sps:$4 sm:$0xff]  }
 0x138   : > { %2612 = vmatprep.mubr.bf16.mxu0 %v296_v33  ;;  %2918 = vmatprep.mubr.bf16.mxu1 %v296_v33  ;;  %v249_v33 = vld [vmem:[#allocation2 + $0x30] sm:$0xff] }
 0x13a   : > { %2624 = vmatpush1.bf16.msra.mxu0 %v4049_v34  ;;  %2930 = vmatpush1.bf16.msra.mxu1 %v4052_v35  ;;  %v261_v34 = vld [vmem:[#allocation2 + $0x90] sm:$0xff] }
 0x13b   : > { %2625 = vmatprep.subr.bf16.mxu0 %v4057_v37  ;;  %2931 = vmatprep.subr.bf16.mxu1 %v4060_v38  ;;  %v4141_v35 = vld [vmem:[%s4668_s25 + $0x804] ss:$16 sps:$4 sm:$0xff]   ;;  %v285_v37 = vpack.c.bf16 %v261_v34, %v249_v33  ;;  %v274_v38 = vld [vmem:[#allocation2 + $0xf8] sm:$0x3]  ;;  %v4217_v33 = vld [vmem:[%s4668_s25 + $0x9a0] ss:$16 sps:$4 sm:$0xff]  }
 0x13c   : > { %v4220_v34 = vld [vmem:[%s4668_s25 + $0x9a8] ss:$16 sps:$4 sm:$0xff]  }
 0x13d   : > { %2613 = vmatmul.mubr.bf16.gmra.mrb[4].mxu0 %v295_v40  ;;  %2919 = vmatmul.mubr.bf16.gmra.mrb[4].mxu1 %v295_v40  ;;  %v4142_v40 = vld [vmem:[%s4668_s25 + $0x808] ss:$16 sps:$4 sm:$0xff]  }
 0x13e   : > { %2626 = vmatpush1.bf16.msra.mxu0 %v4055_v42  ;;  %2932 = vmatpush1.bf16.msra.mxu1 %v4058_v43  ;;  %v4150_v42 = vld [vmem:[%s4668_s25 + $0x82c] ss:$16 sps:$4 sm:$0xff]   ;;  %v298_v43 = vpack.c.bf16 %v274_v38, %v274_v38  ;;  %v4226_v38 = vld [vmem:[%s4668_s25 + $0x9c8] ss:$16 sps:$4 sm:$0xff]  }
 0x13f   : > { %2627 = vmatprep.subr.bf16.mxu0 %v4063_v44  ;;  %2933 = vmatprep.subr.bf16.mxu1 %v4066_v45  ;;  %v4145_v44 = vld [vmem:[%s4668_s25 + $0x820] ss:$16 sps:$4 sm:$0xff]   ;;  %v4148_v45 = vld [vmem:[%s4668_s25 + $0x828] ss:$16 sps:$4 sm:$0xff]  }
 0x140   : > { %2653 = vmatprep.mubr.bf16.mxu0 %v286_v46  ;;  %2959 = vmatprep.mubr.bf16.mxu1 %v286_v46  ;;  %v273_v46 = vld [vmem:[#allocation2 + $0xf0] sm:$0x3] }
 0x142   : > { %2628 = vmatpush1.bf16.msra.mxu0 %v4061_v47  ;;  %2934 = vmatpush1.bf16.msra.mxu1 %v4064_v48  ;;  %v4153_v47 = vld [vmem:[%s4668_s25 + $0x844] ss:$16 sps:$4 sm:$0xff]   ;;  %v4156_v48 = vld [vmem:[%s4668_s25 + $0x84c] ss:$16 sps:$4 sm:$0xff]  }
 0x143   : > { %2629 = vmatprep.subr.bf16.mxu0 %v4069_v49  ;;  %2935 = vmatprep.subr.bf16.mxu1 %v4072_v50  ;;  %v297_v49 = vpack.c.bf16 %v273_v46, %v273_v46  ;;  %v252_v50 = vld [vmem:[#allocation2 + $0x48] sm:$0xff] }
 0x144   : > { %v4240_v46 = vld [vmem:[%s4668_s25 + $0xa0c] ss:$16 sps:$4 sm:$0xff]  }
 0x146   : > { %2630 = vmatpush1.bf16.msra.mxu0 %v4067_v51  ;;  %2936 = vmatpush1.bf16.msra.mxu1 %v4070_v52  ;;  %v264_v51 = vld [vmem:[#allocation2 + $0xa8] sm:$0xff]  ;;  %v4151_v52 = vld [vmem:[%s4668_s25 + $0x840] ss:$16 sps:$4 sm:$0xff]  }
 0x147   : > { %2631 = vmatprep.subr.bf16.mxu0 %v4075_v53  ;;  %2937 = vmatprep.subr.bf16.mxu1 %v4078_v54  ;;  %v4154_v53 = vld [vmem:[%s4668_s25 + $0x848] ss:$16 sps:$4 sm:$0xff]   ;;  %v4159_v54 = vld [vmem:[%s4668_s25 + $0x864] ss:$16 sps:$4 sm:$0xff]  }
 0x14a   : > { %2632 = vmatpush1.bf16.msra.mxu0 %v4073_v55  ;;  %2938 = vmatpush1.bf16.msra.mxu1 %v4076_v56  ;;  %v4162_v55 = vld [vmem:[%s4668_s25 + $0x86c] ss:$16 sps:$4 sm:$0xff]   ;;  %v288_v56 = vpack.c.bf16 %v264_v51, %v252_v50  ;;  %v4238_v50 = vld [vmem:[%s4668_s25 + $0xa08] ss:$16 sps:$4 sm:$0xff]   ;;  %v4243_v51 = vld [vmem:[%s4668_s25 + $0xa24] ss:$16 sps:$4 sm:$0xff]  }
 0x14b   : > { %2633 = vmatprep.subr.bf16.mxu0 %v4081_v57  ;;  %2939 = vmatprep.subr.bf16.mxu1 %v4084_v58  ;;  %v4157_v57 = vld [vmem:[%s4668_s25 + $0x860] ss:$16 sps:$4 sm:$0xff]   ;;  %v4160_v58 = vld [vmem:[%s4668_s25 + $0x868] ss:$16 sps:$4 sm:$0xff]  }
 0x14e   : > { %2634 = vmatpush1.bf16.msra.mxu0 %v4079_v59  ;;  %2940 = vmatpush1.bf16.msra.mxu1 %v4082_v60  ;;  %v4165_v59 = vld [vmem:[%s4668_s25 + $0x884] ss:$16 sps:$4 sm:$0xff]   ;;  %v4168_v60 = vld [vmem:[%s4668_s25 + $0x88c] ss:$16 sps:$4 sm:$0xff]  }
 0x14f   : > { %2635 = vmatprep.subr.bf16.mxu0 %v4087_v61  ;;  %2941 = vmatprep.subr.bf16.mxu1 %v4090_v62  ;;  %v4163_v61 = vld [vmem:[%s4668_s25 + $0x880] ss:$16 sps:$4 sm:$0xff]   ;;  %v4166_v62 = vld [vmem:[%s4668_s25 + $0x888] ss:$16 sps:$4 sm:$0xff]  }
 0x152   : > { %2636 = vmatpush1.bf16.msra.mxu0 %v4085_v63  ;;  %2942 = vmatpush1.bf16.msra.mxu1 %v4088_v0  ;;  %v4171_v63 = vld [vmem:[%s4668_s25 + $0x8a4] ss:$16 sps:$4 sm:$0xff]   ;;  %v4174_v0 = vld [vmem:[%s4668_s25 + $0x8ac] ss:$16 sps:$4 sm:$0xff]  }
 0x153   : > { %2637 = vmatprep.subr.bf16.mxu0 %v4093_v1  ;;  %2943 = vmatprep.subr.bf16.mxu1 %v4096_v2  ;;  %v4169_v1 = vld [vmem:[%s4668_s25 + $0x8a0] ss:$16 sps:$4 sm:$0xff]   ;;  %v4172_v2 = vld [vmem:[%s4668_s25 + $0x8a8] ss:$16 sps:$4 sm:$0xff]  }
 0x156   : > { %2638 = vmatpush1.bf16.msra.mxu0 %v4091_v3  ;;  %2944 = vmatpush1.bf16.msra.mxu1 %v4094_v4  ;;  %v4177_v3 = vld [vmem:[%s4668_s25 + $0x8c4] ss:$16 sps:$4 sm:$0xff]   ;;  %v4180_v4 = vld [vmem:[%s4668_s25 + $0x8cc] ss:$16 sps:$4 sm:$0xff]  }
 0x157   : > { %2639 = vmatprep.subr.bf16.mxu0 %v4099_v5  ;;  %2945 = vmatprep.subr.bf16.mxu1 %v4102_v6  ;;  %v4175_v5 = vld [vmem:[%s4668_s25 + $0x8c0] ss:$16 sps:$4 sm:$0xff]   ;;  %v4178_v6 = vld [vmem:[%s4668_s25 + $0x8c8] ss:$16 sps:$4 sm:$0xff]  }
 0x15a   : > { %2640 = vmatpush1.bf16.msra.mxu0 %v4097_v7  ;;  %2946 = vmatpush1.bf16.msra.mxu1 %v4100_v8  ;;  %v4183_v7 = vld [vmem:[%s4668_s25 + $0x8e4] ss:$16 sps:$4 sm:$0xff]   ;;  %v4186_v8 = vld [vmem:[%s4668_s25 + $0x8ec] ss:$16 sps:$4 sm:$0xff]  }
 0x15b   : > { %2641 = vmatprep.subr.bf16.mxu0 %v4105_v9  ;;  %2947 = vmatprep.subr.bf16.mxu1 %v4108_v10  ;;  %v4181_v9 = vld [vmem:[%s4668_s25 + $0x8e0] ss:$16 sps:$4 sm:$0xff]   ;;  %v4184_v10 = vld [vmem:[%s4668_s25 + $0x8e8] ss:$16 sps:$4 sm:$0xff]  }
 0x15e   : > { %2642 = vmatpush1.bf16.msra.mxu0 %v4103_v11  ;;  %2948 = vmatpush1.bf16.msra.mxu1 %v4106_v12  ;;  %v4189_v11 = vld [vmem:[%s4668_s25 + $0x904] ss:$16 sps:$4 sm:$0xff]   ;;  %v4192_v12 = vld [vmem:[%s4668_s25 + $0x90c] ss:$16 sps:$4 sm:$0xff]  }
 0x15f   : > { %2643 = vmatprep.subr.bf16.mxu0 %v4111_v13  ;;  %2949 = vmatprep.subr.bf16.mxu1 %v4114_v14  ;;  %v4187_v13 = vld [vmem:[%s4668_s25 + $0x900] ss:$16 sps:$4 sm:$0xff]   ;;  %v4190_v14 = vld [vmem:[%s4668_s25 + $0x908] ss:$16 sps:$4 sm:$0xff]  }
 0x162   : > { %2644 = vmatpush1.bf16.msra.mxu0 %v4109_v15  ;;  %2950 = vmatpush1.bf16.msra.mxu1 %v4112_v16  ;;  %v4195_v15 = vld [vmem:[%s4668_s25 + $0x924] ss:$16 sps:$4 sm:$0xff]   ;;  %v4198_v16 = vld [vmem:[%s4668_s25 + $0x92c] ss:$16 sps:$4 sm:$0xff]  }
 0x163   : > { %2645 = vmatprep.subr.bf16.mxu0 %v4117_v17  ;;  %2951 = vmatprep.subr.bf16.mxu1 %v4120_v18  ;;  %v4193_v17 = vld [vmem:[%s4668_s25 + $0x920] ss:$16 sps:$4 sm:$0xff]   ;;  %v4196_v18 = vld [vmem:[%s4668_s25 + $0x928] ss:$16 sps:$4 sm:$0xff]  }
 0x166   : > { %2646 = vmatpush1.bf16.msra.mxu0 %v4115_v19  ;;  %2952 = vmatpush1.bf16.msra.mxu1 %v4118_v20  ;;  %v4201_v19 = vld [vmem:[%s4668_s25 + $0x944] ss:$16 sps:$4 sm:$0xff]   ;;  %v4204_v20 = vld [vmem:[%s4668_s25 + $0x94c] ss:$16 sps:$4 sm:$0xff]  }
 0x167   : > { %2647 = vmatprep.subr.bf16.mxu0 %v4123_v21  ;;  %2953 = vmatprep.subr.bf16.mxu1 %v4126_v22  ;;  %v4199_v21 = vld [vmem:[%s4668_s25 + $0x940] ss:$16 sps:$4 sm:$0xff]   ;;  %v4202_v22 = vld [vmem:[%s4668_s25 + $0x948] ss:$16 sps:$4 sm:$0xff]  }
 0x16a   : > { %2648 = vmatpush1.bf16.msra.mxu0 %v4121_v23  ;;  %2954 = vmatpush1.bf16.msra.mxu1 %v4124_v24  ;;  %v4207_v23 = vld [vmem:[%s4668_s25 + $0x964] ss:$16 sps:$4 sm:$0xff]   ;;  %v4210_v24 = vld [vmem:[%s4668_s25 + $0x96c] ss:$16 sps:$4 sm:$0xff]  }
 0x16b   : > { %2649 = vmatprep.subr.bf16.mxu0 %v4129_v25  ;;  %2955 = vmatprep.subr.bf16.mxu1 %v4132_v26  ;;  %v4205_v25 = vld [vmem:[%s4668_s25 + $0x960] ss:$16 sps:$4 sm:$0xff]   ;;  %v4208_v26 = vld [vmem:[%s4668_s25 + $0x968] ss:$16 sps:$4 sm:$0xff]  }
 0x16e   : > { %2650 = vmatpush1.bf16.msra.mxu0 %v4127_v27  ;;  %2956 = vmatpush1.bf16.msra.mxu1 %v4130_v28  ;;  %v4213_v27 = vld [vmem:[%s4668_s25 + $0x984] ss:$16 sps:$4 sm:$0xff]   ;;  %v4216_v28 = vld [vmem:[%s4668_s25 + $0x98c] ss:$16 sps:$4 sm:$0xff]  }
 0x16f   : > { %2651 = vmatprep.subr.bf16.mxu0 %v4135_v29  ;;  %2957 = vmatprep.subr.bf16.mxu1 %v4138_v30  ;;  %v4211_v29 = vld [vmem:[%s4668_s25 + $0x980] ss:$16 sps:$4 sm:$0xff]   ;;  %v4214_v30 = vld [vmem:[%s4668_s25 + $0x988] ss:$16 sps:$4 sm:$0xff]  }
 0x172   : > { %2652 = vmatpush1.bf16.msra.mxu0 %v4133_v31  ;;  %2958 = vmatpush1.bf16.msra.mxu1 %v4136_v32  ;;  %v4219_v31 = vld [vmem:[%s4668_s25 + $0x9a4] ss:$16 sps:$4 sm:$0xff]   ;;  %v4222_v32 = vld [vmem:[%s4668_s25 + $0x9ac] ss:$16 sps:$4 sm:$0xff]  }
 0x173   : > { %2672 = vmatprep.subr.bf16.mxu0 %v4141_v35  ;;  %2978 = vmatprep.subr.bf16.mxu1 %v4144_v36  ;;  %v4225_v35 = vld [vmem:[%s4668_s25 + $0x9c4] ss:$16 sps:$4 sm:$0xff]   ;;  %v4228_v36 = vld [vmem:[%s4668_s25 + $0x9cc] ss:$16 sps:$4 sm:$0xff]  }
 0x175   : > { %2654 = vmatmul.mubr.bf16.vlgmr.msra.gmra.mrb[0].mxu0 %v285_v37  ;;  %2960 = vmatmul.mubr.bf16.vlgmr.msra.gmra.mrb[0].mxu1 %v285_v37  ;;  %v4223_v37 = vld [vmem:[%s4668_s25 + $0x9c0] ss:$16 sps:$4 sm:$0xff]  }
 0x176   : > { %2673 = vmatpush1.bf16.msra.mxu0 %v4139_v39  ;;  %2979 = vmatpush1.bf16.msra.mxu1 %v4142_v40  ;;  %v4231_v39 = vld [vmem:[%s4668_s25 + $0x9e4] ss:$16 sps:$4 sm:$0xff]   ;;  %v4234_v40 = vld [vmem:[%s4668_s25 + $0x9ec] ss:$16 sps:$4 sm:$0xff]  }
 0x177   : > { %2674 = vmatprep.subr.bf16.mxu0 %v4147_v41  ;;  %2980 = vmatprep.subr.bf16.mxu1 %v4150_v42  ;;  %v4229_v41 = vld [vmem:[%s4668_s25 + $0x9e0] ss:$16 sps:$4 sm:$0xff]   ;;  %v4232_v42 = vld [vmem:[%s4668_s25 + $0x9e8] ss:$16 sps:$4 sm:$0xff]  }
 0x178   : > { %2663 = vmatprep.mubr.bf16.mxu0 %v298_v43  ;;  %2969 = vmatprep.mubr.bf16.mxu1 %v298_v43  ;;  %v251_v43 = vld [vmem:[#allocation2 + $0x40] sm:$0xff] }
 0x17a   : > { %2675 = vmatpush1.bf16.msra.mxu0 %v4145_v44  ;;  %2981 = vmatpush1.bf16.msra.mxu1 %v4148_v45  ;;  %v263_v44 = vld [vmem:[#allocation2 + $0xa0] sm:$0xff] }
 0x17b   : > { %2676 = vmatprep.subr.bf16.mxu0 %v4153_v47  ;;  %2982 = vmatprep.subr.bf16.mxu1 %v4156_v48  ;;  %v4237_v45 = vld [vmem:[%s4668_s25 + $0xa04] ss:$16 sps:$4 sm:$0xff]   ;;  %v287_v47 = vpack.c.bf16 %v263_v44, %v251_v43  ;;  %v276_v48 = vld [vmem:[#allocation2 + $0x108] sm:$0x3] }
 0x17d   : > { %2664 = vmatmul.mubr.bf16.gmra.mrb[4].mxu0 %v297_v49  ;;  %2970 = vmatmul.mubr.bf16.gmra.mrb[4].mxu1 %v297_v49  ;;  %v4235_v49 = vld [vmem:[%s4668_s25 + $0xa00] ss:$16 sps:$4 sm:$0xff]  }
 0x17e   : > { %2677 = vmatpush1.bf16.msra.mxu0 %v4151_v52  ;;  %2983 = vmatpush1.bf16.msra.mxu1 %v4154_v53  ;;  %v4246_v52 = vld [vmem:[%s4668_s25 + $0xa2c] ss:$16 sps:$4 sm:$0xff]   ;;  %v300_v53 = vpack.c.bf16 %v276_v48, %v276_v48 }
 0x17f   : > { %2678 = vmatprep.subr.bf16.mxu0 %v4159_v54  ;;  %2984 = vmatprep.subr.bf16.mxu1 %v4162_v55  ;;  %v4241_v54 = vld [vmem:[%s4668_s25 + $0xa20] ss:$16 sps:$4 sm:$0xff]   ;;  %v4244_v55 = vld [vmem:[%s4668_s25 + $0xa28] ss:$16 sps:$4 sm:$0xff]  }
 0x180   : > { %2704 = vmatprep.mubr.bf16.mxu0 %v288_v56  ;;  %3010 = vmatprep.mubr.bf16.mxu1 %v288_v56  ;;  %v275_v56 = vld [vmem:[#allocation2 + $0x100] sm:$0x3] }
 0x182   : > { %2679 = vmatpush1.bf16.msra.mxu0 %v4157_v57  ;;  %2985 = vmatpush1.bf16.msra.mxu1 %v4160_v58  ;;  %v4249_v57 = vld [vmem:[%s4668_s25 + $0xa44] ss:$16 sps:$4 sm:$0xff]   ;;  %v4252_v58 = vld [vmem:[%s4668_s25 + $0xa4c] ss:$16 sps:$4 sm:$0xff]  }
 0x183   : > { %2680 = vmatprep.subr.bf16.mxu0 %v4165_v59  ;;  %2986 = vmatprep.subr.bf16.mxu1 %v4168_v60  ;;  %v299_v59 = vpack.c.bf16 %v275_v56, %v275_v56  ;;  %v254_v60 = vld [vmem:[#allocation2 + $0x58] sm:$0xff] }
 0x186   : > { %2681 = vmatpush1.bf16.msra.mxu0 %v4163_v61  ;;  %2987 = vmatpush1.bf16.msra.mxu1 %v4166_v62  ;;  %v266_v61 = vld [vmem:[#allocation2 + $0xb8] sm:$0xff]  ;;  %v4247_v62 = vld [vmem:[%s4668_s25 + $0xa40] ss:$16 sps:$4 sm:$0xff]  }
 0x187   : > { %2682 = vmatprep.subr.bf16.mxu0 %v4171_v63  ;;  %2988 = vmatprep.subr.bf16.mxu1 %v4174_v0  ;;  %v4250_v63 = vld [vmem:[%s4668_s25 + $0xa48] ss:$16 sps:$4 sm:$0xff]   ;;  %v4255_v0 = vld [vmem:[%s4668_s25 + $0xa64] ss:$16 sps:$4 sm:$0xff]  }
 0x18a   : > { %2683 = vmatpush1.bf16.msra.mxu0 %v4169_v1  ;;  %2989 = vmatpush1.bf16.msra.mxu1 %v4172_v2  ;;  %v4258_v1 = vld [vmem:[%s4668_s25 + $0xa6c] ss:$16 sps:$4 sm:$0xff]   ;;  %v290_v2 = vpack.c.bf16 %v266_v61, %v254_v60 }
 0x18b   : > { %2684 = vmatprep.subr.bf16.mxu0 %v4177_v3  ;;  %2990 = vmatprep.subr.bf16.mxu1 %v4180_v4  ;;  %v4253_v3 = vld [vmem:[%s4668_s25 + $0xa60] ss:$16 sps:$4 sm:$0xff]   ;;  %v4256_v4 = vld [vmem:[%s4668_s25 + $0xa68] ss:$16 sps:$4 sm:$0xff]  }
 0x18e   : > { %2685 = vmatpush1.bf16.msra.mxu0 %v4175_v5  ;;  %2991 = vmatpush1.bf16.msra.mxu1 %v4178_v6  ;;  %v4261_v5 = vld [vmem:[%s4668_s25 + $0xa84] ss:$16 sps:$4 sm:$0xff]   ;;  %v4264_v6 = vld [vmem:[%s4668_s25 + $0xa8c] ss:$16 sps:$4 sm:$0xff]  }
 0x18f   : > { %2686 = vmatprep.subr.bf16.mxu0 %v4183_v7  ;;  %2992 = vmatprep.subr.bf16.mxu1 %v4186_v8  ;;  %v4259_v7 = vld [vmem:[%s4668_s25 + $0xa80] ss:$16 sps:$4 sm:$0xff]   ;;  %v4262_v8 = vld [vmem:[%s4668_s25 + $0xa88] ss:$16 sps:$4 sm:$0xff]  }
 0x192   : > { %2687 = vmatpush1.bf16.msra.mxu0 %v4181_v9  ;;  %2993 = vmatpush1.bf16.msra.mxu1 %v4184_v10  ;;  %v4267_v9 = vld [vmem:[%s4668_s25 + $0xaa4] ss:$16 sps:$4 sm:$0xff]   ;;  %v4270_v10 = vld [vmem:[%s4668_s25 + $0xaac] ss:$16 sps:$4 sm:$0xff]  }
 0x193   : > { %2688 = vmatprep.subr.bf16.mxu0 %v4189_v11  ;;  %2994 = vmatprep.subr.bf16.mxu1 %v4192_v12  ;;  %v4265_v11 = vld [vmem:[%s4668_s25 + $0xaa0] ss:$16 sps:$4 sm:$0xff]   ;;  %v4268_v12 = vld [vmem:[%s4668_s25 + $0xaa8] ss:$16 sps:$4 sm:$0xff]  }
 0x196   : > { %2689 = vmatpush1.bf16.msra.mxu0 %v4187_v13  ;;  %2995 = vmatpush1.bf16.msra.mxu1 %v4190_v14  ;;  %v4273_v13 = vld [vmem:[%s4668_s25 + $0xac4] ss:$16 sps:$4 sm:$0xff]   ;;  %v4276_v14 = vld [vmem:[%s4668_s25 + $0xacc] ss:$16 sps:$4 sm:$0xff]  }
 0x197   : > { %2690 = vmatprep.subr.bf16.mxu0 %v4195_v15  ;;  %2996 = vmatprep.subr.bf16.mxu1 %v4198_v16  ;;  %v4271_v15 = vld [vmem:[%s4668_s25 + $0xac0] ss:$16 sps:$4 sm:$0xff]   ;;  %v4274_v16 = vld [vmem:[%s4668_s25 + $0xac8] ss:$16 sps:$4 sm:$0xff]  }
 0x19a   : > { %2691 = vmatpush1.bf16.msra.mxu0 %v4193_v17  ;;  %2997 = vmatpush1.bf16.msra.mxu1 %v4196_v18  ;;  %v4279_v17 = vld [vmem:[%s4668_s25 + $0xae4] ss:$16 sps:$4 sm:$0xff]   ;;  %v4282_v18 = vld [vmem:[%s4668_s25 + $0xaec] ss:$16 sps:$4 sm:$0xff]  }
 0x19b   : > { %2692 = vmatprep.subr.bf16.mxu0 %v4201_v19  ;;  %2998 = vmatprep.subr.bf16.mxu1 %v4204_v20  ;;  %v4277_v19 = vld [vmem:[%s4668_s25 + $0xae0] ss:$16 sps:$4 sm:$0xff]   ;;  %v4280_v20 = vld [vmem:[%s4668_s25 + $0xae8] ss:$16 sps:$4 sm:$0xff]  }
 0x19e   : > { %2693 = vmatpush1.bf16.msra.mxu0 %v4199_v21  ;;  %2999 = vmatpush1.bf16.msra.mxu1 %v4202_v22  ;;  %v4285_v21 = vld [vmem:[%s4668_s25 + $0xb04] ss:$16 sps:$4 sm:$0xff]   ;;  %v4288_v22 = vld [vmem:[%s4668_s25 + $0xb0c] ss:$16 sps:$4 sm:$0xff]  }
 0x19f   : > { %2694 = vmatprep.subr.bf16.mxu0 %v4207_v23  ;;  %3000 = vmatprep.subr.bf16.mxu1 %v4210_v24  ;;  %v4283_v23 = vld [vmem:[%s4668_s25 + $0xb00] ss:$16 sps:$4 sm:$0xff]   ;;  %v4286_v24 = vld [vmem:[%s4668_s25 + $0xb08] ss:$16 sps:$4 sm:$0xff]  }
 0x1a2   : > { %2695 = vmatpush1.bf16.msra.mxu0 %v4205_v25  ;;  %3001 = vmatpush1.bf16.msra.mxu1 %v4208_v26  ;;  %v253_v25 = vld [vmem:[#allocation2 + $0x50] sm:$0xff] }
 0x1a3   : > { %2696 = vmatprep.subr.bf16.mxu0 %v4213_v27  ;;  %3002 = vmatprep.subr.bf16.mxu1 %v4216_v28  ;;  %v265_v26 = vld [vmem:[#allocation2 + $0xb0] sm:$0xff]  ;;  %v278_v27 = vld [vmem:[#allocation2 + $0x118] sm:$0x3] }
 0x1a4   : > { %v289_v28 = vpack.c.bf16 %v265_v26, %v253_v25 }
 0x1a6   : > { %2697 = vmatpush1.bf16.msra.mxu0 %v4211_v29  ;;  %3003 = vmatpush1.bf16.msra.mxu1 %v4214_v30  ;;  %v302_v29 = vpack.c.bf16 %v278_v27, %v278_v27  ;;  %v277_v30 = vld [vmem:[#allocation2 + $0x110] sm:$0x3] }
 0x1a7   : > { %2698 = vmatprep.subr.bf16.mxu0 %v4219_v31  ;;  %3004 = vmatprep.subr.bf16.mxu1 %v4222_v32  ;;  %v301_v31 = vpack.c.bf16 %v277_v30, %v277_v30  ;;  %v661_v32 = vlaneseq }
 0x1aa   : > { %2699 = vmatpush1.bf16.msra.mxu0 %v4217_v33  ;;  %3005 = vmatpush1.bf16.msra.mxu1 %v4220_v34  ;;  %v662_v33 = vshrl.u32 %v661_v32, 7 }
 0x1ab   : > { %2700 = vmatprep.subr.bf16.mxu0 %v4225_v35  ;;  %3006 = vmatprep.subr.bf16.mxu1 %v4228_v36  ;;  %v659_v36 = vld [vmem:[%s211_s28] sm:$0xf] }
 0x1ac   : > { %v663_v34 = vsub.s32 0, %v662_v33  ;;  %v671_v35 = vsub.s32 2, %v662_v33 }
 0x1ae   : > { %2701 = vmatpush1.bf16.msra.mxu0 %v4223_v37  ;;  %3007 = vmatpush1.bf16.msra.mxu1 %v4226_v38  ;;  %v667_v37 = vsub.s32 1, %v662_v33  ;;  %v675_v38 = vsub.s32 3, %v662_v33 }
 0x1af   : > { %2702 = vmatprep.subr.bf16.mxu0 %v4231_v39  ;;  %3008 = vmatprep.subr.bf16.mxu1 %v4234_v40  ;;  %v664_v39 = vrot.slane %v659_v36, %v663_v34  ;;  %v672_v40 = vrot.slane %v659_v36, %v671_v35 }
 0x1b2   : > { %2703 = vmatpush1.bf16.msra.mxu0 %v4229_v41  ;;  %3009 = vmatpush1.bf16.msra.mxu1 %v4232_v42  ;;  %v668_v41 = vrot.slane %v659_v36, %v667_v37  ;;  %v676_v42 = vrot.slane %v659_v36, %v675_v38 }
 0x1b3   : > { %2723 = vmatprep.subr.bf16.mxu0 %v4237_v45  ;;  %3029 = vmatprep.subr.bf16.mxu1 %v4240_v46 }
 0x1b5   : > { %2705 = vmatmul.mubr.bf16.vlgmr.msra.gmra.mrb[0].mxu0 %v287_v47  ;;  %3011 = vmatmul.mubr.bf16.vlgmr.msra.gmra.mrb[0].mxu1 %v287_v47 }
 0x1b6   : > { %2724 = vmatpush1.bf16.msra.mxu0 %v4235_v49  ;;  %3030 = vmatpush1.bf16.msra.mxu1 %v4238_v50 }
 0x1b7   : > { %2725 = vmatprep.subr.bf16.mxu0 %v4243_v51  ;;  %3031 = vmatprep.subr.bf16.mxu1 %v4246_v52 }
 0x1b8   : > { %2714 = vmatprep.mubr.bf16.mxu0 %v300_v53  ;;  %3020 = vmatprep.mubr.bf16.mxu1 %v300_v53 }
 0x1ba   : > { %2726 = vmatpush1.bf16.msra.mxu0 %v4241_v54  ;;  %3032 = vmatpush1.bf16.msra.mxu1 %v4244_v55 }
 0x1bb   : > { %2727 = vmatprep.subr.bf16.mxu0 %v4249_v57  ;;  %3033 = vmatprep.subr.bf16.mxu1 %v4252_v58 }
 0x1bd   : > { %2715 = vmatmul.mubr.bf16.gmra.mrb[4].mxu0 %v299_v59  ;;  %3021 = vmatmul.mubr.bf16.gmra.mrb[4].mxu1 %v299_v59 }
 0x1be   : > { %2728 = vmatpush1.bf16.msra.mxu0 %v4247_v62  ;;  %3034 = vmatpush1.bf16.msra.mxu1 %v4250_v63 }
 0x1bf   : > { %2729 = vmatprep.subr.bf16.mxu0 %v4255_v0  ;;  %3035 = vmatprep.subr.bf16.mxu1 %v4258_v1 }
 0x1c0   : > { %3579 = vmatprep.mubr.msk.bf16.mxu0 %vm2461_vm0, %v290_v2  ;;  %3581 = vmatprep.mubr.msk.bf16.mxu1 %vm2461_vm0, %v290_v2 }
 0x1c2   : > { %2730 = vmatpush1.bf16.msra.mxu0 %v4253_v3  ;;  %3036 = vmatpush1.bf16.msra.mxu1 %v4256_v4 }
 0x1c3   : > { %2731 = vmatprep.subr.bf16.mxu0 %v4261_v5  ;;  %3037 = vmatprep.subr.bf16.mxu1 %v4264_v6 }
 0x1c6   : > { %2732 = vmatpush1.bf16.msra.mxu0 %v4259_v7  ;;  %3038 = vmatpush1.bf16.msra.mxu1 %v4262_v8 }
 0x1c7   : > { %2733 = vmatprep.subr.bf16.mxu0 %v4267_v9  ;;  %3039 = vmatprep.subr.bf16.mxu1 %v4270_v10 }
 0x1ca   : > { %2734 = vmatpush1.bf16.msra.mxu0 %v4265_v11  ;;  %3040 = vmatpush1.bf16.msra.mxu1 %v4268_v12 }
 0x1cb   : > { %2735 = vmatprep.subr.bf16.mxu0 %v4273_v13  ;;  %3041 = vmatprep.subr.bf16.mxu1 %v4276_v14 }
 0x1ce   : > { %2736 = vmatpush1.bf16.msra.mxu0 %v4271_v15  ;;  %3042 = vmatpush1.bf16.msra.mxu1 %v4274_v16 }
 0x1cf   : > { %2737 = vmatprep.subr.bf16.mxu0 %v4279_v17  ;;  %3043 = vmatprep.subr.bf16.mxu1 %v4282_v18 }
 0x1d2   : > { %2738 = vmatpush1.bf16.msra.mxu0 %v4277_v19  ;;  %3044 = vmatpush1.bf16.msra.mxu1 %v4280_v20 }
 0x1d3   : > { %2739 = vmatprep.subr.bf16.mxu0 %v4285_v21  ;;  %3045 = vmatprep.subr.bf16.mxu1 %v4288_v22 }
 0x1d6   : > { %2740 = vmatpush1.bf16.msra.mxu0 %v4283_v23  ;;  %3046 = vmatpush1.bf16.msra.mxu1 %v4286_v24 }
 0x1d9   : > { %2756 = vmatmul.mubr.bf16.vlgmr.msra.gmra.mrb[0].mxu0 %v289_v28  ;;  %3062 = vmatmul.mubr.bf16.vlgmr.msra.gmra.mrb[0].mxu1 %v289_v28 }
 0x1da   : > { %3580 = vmatprep.mubr.msk.bf16.mxu0 %vm2461_vm0, %v302_v29  ;;  %3582 = vmatprep.mubr.msk.bf16.mxu1 %vm2461_vm0, %v302_v29 }
 0x1e1   : > { %2766 = vmatmul.mubr.bf16.gmra.mrb[4].mxu0 %v301_v31  ;;  %3072 = vmatmul.mubr.bf16.gmra.mrb[4].mxu1 %v301_v31 }
 0x2ac   : > { %v2757_v43 = vpop.f32.mrb[0].mxu0  ;;  %v3063_v44 = vpop.f32.mrb[0].mxu1 }
 0x2ad   : > { %v3590_v45 = vadd.f32 %v2757_v43, %v664_v39  ;;  %v3596_v46 = vadd.f32 %v3063_v44, %v672_v40  ;;  %v2759_v47 = vpop.f32.mrb[1].mxu0  ;;  %v3065_v48 = vpop.f32.mrb[1].mxu1 }
 0x2ae   : > { %v3591_v49 = vadd.f32 %v2759_v47, %v668_v41  ;;  %v3597_v50 = vadd.f32 %v3065_v48, %v676_v42  ;;  %v2761_v51 = vpop.f32.mrb[2].mxu0  ;;  %v3067_v52 = vpop.f32.mrb[2].mxu1 }
 0x2af   : > { %3080 = vst [vmem:[%s5036_s17] sm:$0xff] %v3590_v45  ;;  %3082 = vst [vmem:[%s5036_s17 + $0x10] sm:$0xff] %v3596_v46  ;;  %v3592_v53 = vadd.f32 %v2761_v51, %v664_v39  ;;  %v3598_v54 = vadd.f32 %v3067_v52, %v672_v40  ;;  %v2763_v55 = vpop.f32.mrb[3].mxu0  ;;  %v3069_v56 = vpop.f32.mrb[3].mxu1 }
 0x2b0   : > { %3081 = vst [vmem:[%s5036_s17 + $0x8] sm:$0xff] %v3591_v49  ;;  %3083 = vst [vmem:[%s5036_s17 + $0x18] sm:$0xff] %v3597_v50  ;;  %v3593_v57 = vadd.f32 %v2763_v55, %v668_v41  ;;  %v3599_v58 = vadd.f32 %v3069_v56, %v676_v42 }
 0x2b1   : > { %3084 = vst [vmem:[%s5036_s17 + $0x20] sm:$0xff] %v3592_v53  ;;  %3086 = vst [vmem:[%s5036_s17 + $0x30] sm:$0xff] %v3598_v54 }
 0x2b2   : > { %3085 = vst [vmem:[%s5036_s17 + $0x28] sm:$0xff] %v3593_v57  ;;  %3087 = vst [vmem:[%s5036_s17 + $0x38] sm:$0xff] %v3599_v58 }
 0x2b4   : > { %v2767_v59 = vpop.f32.mrb[4].mxu0  ;;  %v3073_v60 = vpop.f32.mrb[4].mxu1 }
 0x2b5   : > { %v3594_v61 = vadd.f32 %v2767_v59, %v664_v39  ;;  %v3600_v62 = vadd.f32 %v3073_v60, %v672_v40  ;;  %v2769_v63 = vpop.f32.mrb[5].mxu0  ;;  %v3075_v0 = vpop.f32.mrb[5].mxu1 }
 0x2b6   : > { %v3595_v1 = vadd.f32 %v2769_v63, %v668_v41  ;;  %v3601_v2 = vadd.f32 %v3075_v0, %v676_v42  ;;  %v2771_v3 = vpop.f32.mrb[6].mxu0  ;;  %v3077_v4 = vpop.f32.mrb[6].mxu1 }
 0x2b7   : > { %3088 = vst [vmem:[%s5036_s17 + $0x40] sm:$0x3] %v3594_v61  ;;  %3090 = vst [vmem:[%s5036_s17 + $0x50] sm:$0x3] %v3600_v62  ;;  %v2772_v5 = vpop.f32.mrb[7].mxu0  ;;  %v3078_v6 = vpop.f32.mrb[7].mxu1 }
 0x2b8   : > { %3089 = vst [vmem:[%s5036_s17 + $0x48] sm:$0x3] %v3595_v1  ;;  %3091 = vst [vmem:[%s5036_s17 + $0x58] sm:$0x3] %v3601_v2 }
 0x2b9   : > { %4390 = shalt.err (!%p4387_p6)
}
 0x2ba   : > { %s4391_s22 = scalar_lea.hbm %s5051_s7, 1536  ;;  %s4395_s25 = scalar_lea.hbm %s5103_s3, 13824 }
 0x2bb   : > { %p4392_p8 = scmp.ne.s32.totalorder %s5051_s7, %s4391_s22  ;;  %p4396_p9 = scmp.lt.u32.totalorder %s5051_s7, %s5103_s3 }
 0x2bc   : > { %p4397_p1 = scmp.lt.u32.totalorder %s4395_s25, %s4391_s22  ;;  %p4399_p2 = scmp.lt.u32.totalorder %s4391_s22, %s5051_s7 }
 0x2bd   : > { %p4393_p11 = pnand %p4392_p8, %p5124_p3 }
 0x2be   : > { %p4398_p13 = por %p4397_p1, %p4396_p9 }
 0x2bf   : > { %p4394_p5 = pneg %p4393_p11 }
 0x2c0   : > { %p4400_p0 = por %p4399_p2, %p4398_p13 }
 0x2c2   : > { %p4401_p10 = pnand %p4400_p0, %p4394_p5 }
 0x2c4   : > { %4404 = shalt.err (!%p4401_p10)
}
 0x2c5   : > { %s4458_s4 = smov 512   ;;  %s4459_s17 = smov 4608  }
 0x2c6   : > { %s4460_s20 = smov 32  }
 0x2c7   : > { %3693 = dma.vmem_to_hbm [thread:$0]  (%p5124_p3), %s5053_s5, 1536, %s5051_s7, %s3093_s24, %s4458_s4, %s4459_s17, %s4460_s20  }
 0x2c8 PF: > { %p3713_p12 = scmp.ge.s32.totalorder %s4447_s15, 2  ;;  %s3121_s10 = sand.u32 1, %s4435_s12  }
 0x2c9   : > { %p5125_p7 = scmp.ne.s32.totalorder %s5114_s29, 0  ;;  %s3122_s11 = scalar_lea.sflag [#allocation4], %s3121_s10 }
 0x2cb   : > { %p3707_p4 = pnand %p3713_p12, %p5125_p7 }
 0x2cd   : > { %4430 = dma.done.wait (!%p3707_p4), %s3122_s11, 1536  }
 0x2ce   : > { %4432 = vsyncadd (!%p3707_p4), %s3122_s11, 4294965760  ;;  %p17_p6 = scmp.ge.s32.totalorder %s4502_s16, 11   ;;  %s5126_s12 = smov %s4439_s13 }
 0x2cf   : > { %s5127_s13 = smov %s4443_s14  ;;  %s5128_s14 = smov %s4512_s19 }
 0x2d0   : > { %s5129_s15 = smov %s4502_s16  ;;  %19 = sbr.rel (!%p17_p6) target bundleno = 6 (0x6), region = 93 }
 0x2d7   :  { %3127 = vsyncpa [#allocation3], 1 }
 0x2d8   :  { %3129 = vsyncpa [#allocation3 + $0x1], 1 }
 0x2d9   :  { %3130 = vsyncpa [#allocation6], 1 }
 0x2da   :  { %3132 = vsyncpa [#allocation6 + $0x1], 1 }
 0x2db   :  { %3133 = vsyncpa [#allocation4], 1 }
 0x2dc   :  { %3135 = vsyncpa [#allocation4 + $0x1], 1 }

</bundles_post_ra>
